<compile_context>
chip_gen: v5e
topology: v5e:2x2
jax: 0.10.0
libtpu: 0.0.40
codegen_flags: <defaults>
</compile_context>

<pallas_src>
import functools
import math

import jax
import jax.numpy as jnp
from jax.experimental import pallas as pl
from jax.experimental.pallas import tpu as pltpu


def _round_up(x, m):
    return ((x + m - 1) // m) * m


# ---------------------------------------------------------------------------
# Kernel
# ---------------------------------------------------------------------------
def decoder_kernel(x_ref, enc_ref, mask_ref, attn_w_ref, vecs_ref,
                   ff_w1_ref, ff_b1_ref, ff_w2_ref, out_ref,
                   *, num_heads, d_model, seq_len, blk_b):
    H = num_heads
    T = seq_len
    BB = blk_b
    Dp = x_ref.shape[-1]
    dhp = Dp // H
    R = BB * T
    mdt = attn_w_ref.dtype                      # MXU dtype (bf16 by default)

    # Fold (batch_block, time) into the row/sublane dimension.
    x = x_ref[...].reshape(R, Dp).astype(jnp.float32)
    enc = enc_ref[...].reshape(R, Dp).astype(jnp.float32)
    fmask = mask_ref[...]                        # [T, T] additive mask

    # Consolidated per-feature params, loaded once (f32).
    vecs = vecs_ref[...]                         # [15, Dp]
    s_bq, s_bk, s_bv, s_bo = vecs[0:1], vecs[1:2], vecs[2:3], vecs[3:4]
    c_bq, c_bk, c_bv, c_bo = vecs[4:5], vecs[5:6], vecs[6:7], vecs[7:8]
    ln1_g, ln1_b = vecs[8:9], vecs[9:10]
    ln2_g, ln2_b = vecs[10:11], vecs[11:12]
    ln3_g, ln3_b = vecs[12:13], vecs[13:14]
    ff_b2 = vecs[14:15]
    ff_b1 = ff_b1_ref[...]                       # [1, Fp]

    # LayerNorm stats must only see the real d_model columns (padding is zero).
    col_ids = jax.lax.broadcasted_iota(jnp.int32, (1, Dp), 1)
    col_mask = (col_ids < d_model).astype(jnp.float32)
    inv_d = jnp.float32(1.0 / d_model)
    # 1/sqrt(head_dim) folded into q instead of scaling the scores tensor.
    scale = jnp.float32(1.0 / math.sqrt(d_model // H))

    def layernorm(v, gamma, beta, eps=1e-5):
        mu = jnp.sum(v, axis=-1, keepdims=True) * inv_d
        diff = (v - mu) * col_mask
        var = jnp.sum(diff * diff, axis=-1, keepdims=True) * inv_d
        return diff * jax.lax.rsqrt(var + eps) * gamma + beta

    def mha(q_in, kv_in, w_base, bq, bk, bv, bo, mask):
        wq = attn_w_ref[w_base + 0]
        wk = attn_w_ref[w_base + 1]
        wv = attn_w_ref[w_base + 2]
        wo = attn_w_ref[w_base + 3]
        q_mm = q_in.astype(mdt)
        kv_mm = q_mm if (kv_in is q_in) else kv_in.astype(mdt)
        q = (jnp.dot(q_mm, wq, preferred_element_type=jnp.float32) + bq) * scale
        k = jnp.dot(kv_mm, wk, preferred_element_type=jnp.float32) + bk
        v = jnp.dot(kv_mm, wv, preferred_element_type=jnp.float32) + bv
        q = q.astype(mdt)
        k = k.astype(mdt)
        v = v.astype(mdt)

        ctx_rows = []
        for b in range(BB):                      # static unroll over the batch block
            qb = q[b * T:(b + 1) * T].reshape(T, H, dhp)
            kb = k[b * T:(b + 1) * T].reshape(T, H, dhp)
            vb = v[b * T:(b + 1) * T].reshape(T, H, dhp)
            s = jnp.einsum('thd,shd->hts', qb, kb,
                           preferred_element_type=jnp.float32)   # [H, T, Tk]
            if mask is not None:
                s = s + mask[None, :, :]
            m = jnp.max(s, axis=-1, keepdims=True)
            p = jnp.exp(s - m)
            denom = jnp.sum(p, axis=-1, keepdims=True)
            p = p * pl.reciprocal(denom, approx=True)
            ctx = jnp.einsum('hts,shd->thd', p.astype(mdt), vb,
                             preferred_element_type=jnp.float32)  # [T, H, dhp]
            ctx_rows.append(ctx.reshape(T, Dp))
        ctx_all = ctx_rows[0] if BB == 1 else jnp.concatenate(ctx_rows, axis=0)
        return jnp.dot(ctx_all.astype(mdt), wo,
                       preferred_element_type=jnp.float32) + bo

    # --- sublayer 1: masked self attention + residual + norm1 ---------------
    sa = mha(x, x, 0, s_bq, s_bk, s_bv, s_bo, fmask)
    h1 = layernorm(sa + x, ln1_g, ln1_b)

    # --- sublayer 2: encoder-decoder (cross) attention + residual + norm2 ---
    ca = mha(h1, enc, 4, c_bq, c_bk, c_bv, c_bo, None)
    h2 = layernorm(ca + h1, ln2_g, ln2_b)

    # --- sublayer 3: position-wise feed forward + residual + norm3 ----------
    hidden = jnp.maximum(
        jnp.dot(h2.astype(mdt), ff_w1_ref[...],
                preferred_element_type=jnp.float32) + ff_b1, 0.0)
    ff = jnp.dot(hidden.astype(mdt), ff_w2_ref[...],
                 preferred_element_type=jnp.float32) + ff_b2
    h3 = layernorm(ff + h2, ln3_g, ln3_b)

    out_ref[...] = h3.reshape(BB, T, Dp).astype(out_ref.dtype)


# ---------------------------------------------------------------------------
# Weight packing (lane-dense padding + consolidation into few tensors)
# ---------------------------------------------------------------------------
def _pack_weights(params, d_model, d_ff, num_heads, d_pad, f_pad, matmul_dtype):
    H = num_heads
    dh = d_model // H
    dhp = d_pad // H

    def pad_in_proj(w, b):
        # Output columns are per-head -> head-blocked padding so that
        # reshape(T, H, dhp) in the kernel keeps heads separated.
        wp = jnp.zeros((d_pad, d_pad), jnp.float32)
        bp = jnp.zeros((d_pad,), jnp.float32)
        for h in range(H):
            wp = wp.at[:d_model, h * dhp:h * dhp + dh].set(w[:, h * dh:(h + 1) * dh])
            bp = bp.at[h * dhp:h * dhp + dh].set(b[h * dh:(h + 1) * dh])
        return wp, bp

    def pad_out_proj(w, b):
        wp = jnp.zeros((d_pad, d_pad), jnp.float32)
        for h in range(H):
            wp = wp.at[h * dhp:h * dhp + dh, :d_model].set(w[h * dh:(h + 1) * dh, :])
        bp = jnp.zeros((d_pad,), jnp.float32).at[:d_model].set(b)
        return wp, bp

    def pad_model_vec(v):
        return jnp.zeros((d_pad,), jnp.float32).at[:d_model].set(v)

    ws, bs = [], []
    for pfx in ('s', 'c'):
        for name, padder in (('wq', pad_in_proj), ('wk', pad_in_proj),
                             ('wv', pad_in_proj), ('wo', pad_out_proj)):
            w, b = padder(params[f'{pfx}_{name}'], params[f'{pfx}_b{name[-1]}'])
            ws.append(w)
            bs.append(b)
    attn_w = jnp.stack(ws).astype(matmul_dtype)                  # [8, Dp, Dp]

    ln = [pad_model_vec(params[n]) for n in
          ('ln1_g', 'ln1_b', 'ln2_g', 'ln2_b', 'ln3_g', 'ln3_b')]
    vecs = jnp.stack(bs + ln + [pad_model_vec(params['ff_b2'])])  # [15, Dp]

    ff_w1 = jnp.zeros((d_pad, f_pad), jnp.float32).at[:d_model, :d_ff] \
        .set(params['ff_w1']).astype(matmul_dtype)
    ff_b1 = jnp.zeros((1, f_pad), jnp.float32).at[0, :d_ff].set(params['ff_b1'])
    ff_w2 = jnp.zeros((f_pad, d_pad), jnp.float32).at[:d_ff, :d_model] \
        .set(params['ff_w2']).astype(matmul_dtype)
    return attn_w, vecs, ff_w1, ff_b1, ff_w2


# ---------------------------------------------------------------------------
# Wrapper
# ---------------------------------------------------------------------------
def decoder_forward(inputs, encoder_output, future_mask, params, num_heads,
                    matmul_dtype=jnp.bfloat16, blk_b=None):
    B, T, D = inputs.shape
    d_ff = params['ff_w1'].shape[1]

    # Lane-dense padded feature dims.
    Dp = _round_up(max(D, 128), 128)
    while Dp % num_heads != 0:
        Dp += 128
    Fp = _round_up(max(d_ff, 128), 128)

    attn_w, vecs, ff_w1, ff_b1, ff_w2 = _pack_weights(
        params, D, d_ff, num_heads, Dp, Fp, matmul_dtype)

    if Dp > D:
        pad = ((0, 0), (0, 0), (0, Dp - D))
        x_p = jnp.pad(inputs, pad)
        enc_p = jnp.pad(encoder_output, pad)
    else:
        x_p, enc_p = inputs, encoder_output

    if future_mask is None:
        future_mask = jnp.zeros((T, T), jnp.float32)
    future_mask = future_mask.astype(jnp.float32)

    # Batch block size: aim for >=128 folded rows per grid step.
    if blk_b is None:
        blk_b = min(B, max(1, -(-128 // T)))
    while B % blk_b != 0:
        blk_b -= 1
    grid = (B // blk_b,)

    act_spec = pl.BlockSpec((blk_b, T, Dp), lambda b: (b, 0, 0))
    kernel = functools.partial(decoder_kernel, num_heads=num_heads, d_model=D,
                               seq_len=T, blk_b=blk_b)

    out = pl.pallas_call(
        kernel,
        out_shape=jax.ShapeDtypeStruct((B, T, Dp), inputs.dtype),
        grid=grid,
        in_specs=[
            act_spec,                                        # inputs
            act_spec,                                        # encoder_output
            pl.BlockSpec((T, T), lambda b: (0, 0)),          # future mask
            pl.BlockSpec((8, Dp, Dp), lambda b: (0, 0, 0)),  # attn projections
            pl.BlockSpec((15, Dp), lambda b: (0, 0)),        # biases + LN params
            pl.BlockSpec((Dp, Fp), lambda b: (0, 0)),        # ff_w1
            pl.BlockSpec((1, Fp), lambda b: (0, 0)),         # ff_b1
            pl.BlockSpec((Fp, Dp), lambda b: (0, 0)),        # ff_w2
        ],
        out_specs=pl.BlockSpec((blk_b, T, Dp), lambda b: (b, 0, 0)),
        compiler_params=pltpu.CompilerParams(
            dimension_semantics=("parallel",),
            vmem_limit_bytes=48 * 1024 * 1024),
    )(x_p, enc_p, future_mask, attn_w, vecs, ff_w1, ff_b1, ff_w2)

    return out[:, :, :D]


# ---------------------------------------------------------------------------
# Pure-JAX reference (for numerical verification) and parameter init
# ---------------------------------------------------------------------------
def decoder_reference(inputs, encoder_output, future_mask, params, num_heads):
    def ln(v, g, b, eps=1e-5):
        mu = jnp.mean(v, -1, keepdims=True)
        var = jnp.mean((v - mu) ** 2, -1, keepdims=True)
        return (v - mu) * jax.lax.rsqrt(var + eps) * g + b

    def mha(q_in, kv_in, pfx, mask):
        B, T, D = q_in.shape
        Tk = kv_in.shape[1]
        H = num_heads
        dh = D // H
        q = q_in @ params[f'{pfx}_wq'] + params[f'{pfx}_bq']
        k = kv_in @ params[f'{pfx}_wk'] + params[f'{pfx}_bk']
        v = kv_in @ params[f'{pfx}_wv'] + params[f'{pfx}_bv']
        q = q.reshape(B, T, H, dh)
        k = k.reshape(B, Tk, H, dh)
        v = v.reshape(B, Tk, H, dh)
        s = jnp.einsum('bthd,bshd->bhts', q, k) / jnp.sqrt(jnp.float32(dh))
        if mask is not None:
            s = s + mask[None, None]
        p = jax.nn.softmax(s, axis=-1)
        ctx = jnp.einsum('bhts,bshd->bthd', p, v).reshape(B, T, D)
        return ctx @ params[f'{pfx}_wo'] + params[f'{pfx}_bo']

    x = inputs
    h1 = ln(mha(x, x, 's', future_mask) + x, params['ln1_g'], params['ln1_b'])
    h2 = ln(mha(h1, encoder_output, 'c', None) + h1,
            params['ln2_g'], params['ln2_b'])
    ff = jnp.maximum(h2 @ params['ff_w1'] + params['ff_b1'], 0.0) \
        @ params['ff_w2'] + params['ff_b2']
    return ln(ff + h2, params['ln3_g'], params['ln3_b'])


def init_params(key, d_model, d_ff):
    keys = iter(jax.random.split(key, 32))
    s = 0.05
    p = {}
    for n in ('s_wq', 's_wk', 's_wv', 's_wo', 'c_wq', 'c_wk', 'c_wv', 'c_wo'):
        p[n] = s * jax.random.normal(next(keys), (d_model, d_model), jnp.float32)
        p[n.replace('w', 'b')] = 0.02 * jax.random.normal(
            next(keys), (d_model,), jnp.float32)
    for i in (1, 2, 3):
        p[f'ln{i}_g'] = 1.0 + 0.05 * jax.random.normal(
            next(keys), (d_model,), jnp.float32)
        p[f'ln{i}_b'] = 0.05 * jax.random.normal(next(keys), (d_model,), jnp.float32)
    p['ff_w1'] = s * jax.random.normal(next(keys), (d_model, d_ff), jnp.float32)
    p['ff_b1'] = 0.02 * jax.random.normal(next(keys), (d_ff,), jnp.float32)
    p['ff_w2'] = s * jax.random.normal(next(keys), (d_ff, d_model), jnp.float32)
    p['ff_b2'] = 0.02 * jax.random.normal(next(keys), (d_model,), jnp.float32)
    return p


if __name__ == "__main__":
    # Small module-consistent shapes: batch=2, seq=8, d_model=32, d_ff=64, heads=4
    B, T, D, D_FF, H = 2, 8, 32, 64, 4

    key = jax.random.PRNGKey(0)
    k_in, k_enc, k_par = jax.random.split(key, 3)

    inputs = jax.random.normal(k_in, (B, T, D), jnp.float32)
    encoder_output = jax.random.normal(k_enc, (B, T, D), jnp.float32)

    # Additive causal future mask (0 allowed, -1e9 on future positions).
    row = jax.lax.broadcasted_iota(jnp.int32, (T, T), 0)
    col = jax.lax.broadcasted_iota(jnp.int32, (T, T), 1)
    future_mask = jnp.where(col <= row, 0.0, -1e9).astype(jnp.float32)

    params = init_params(k_par, D, D_FF)

    # Default (bf16 MXU) run.
    out = decoder_forward(inputs, encoder_output, future_mask, params, num_heads=H)
    jax.block_until_ready(out)
    assert out.shape == (B, T, D)
    assert bool(jnp.all(jnp.isfinite(out)))

    # Numerical verification with f32 matmuls against the pure-JAX reference.
    out_f32 = decoder_forward(inputs, encoder_output, future_mask, params,
                              num_heads=H, matmul_dtype=jnp.float32)
    ref = decoder_reference(inputs, encoder_output, future_mask, params, num_heads=H)
    err = float(jnp.max(jnp.abs(out_f32 - ref)))
    assert err < 2e-2, f"max abs error vs reference: {err}"

    print("KERNEL_OK")
</pallas_src>

<mosaic_0001>
module attributes {stable_mosaic.version = 11 : i64} {
  func.func @decoder_kernel(%arg0: i32, %arg1: memref<2x8x128xf32, #tpu.memory_space<vmem>>, %arg2: memref<2x8x128xf32, #tpu.memory_space<vmem>>, %arg3: memref<8x8xf32, #tpu.memory_space<vmem>>, %arg4: memref<8x128x128xbf16, #tpu.memory_space<vmem>>, %arg5: memref<15x128xf32, #tpu.memory_space<vmem>>, %arg6: memref<128x128xbf16, #tpu.memory_space<vmem>>, %arg7: memref<1x128xf32, #tpu.memory_space<vmem>>, %arg8: memref<128x128xbf16, #tpu.memory_space<vmem>>, %arg9: memref<2x8x128xf32, #tpu.memory_space<vmem>>) attributes {dimension_semantics = [#tpu.dimension_semantics<parallel>], iteration_bounds = array<i64: 1>, scalar_prefetch = 0 : i64, scratch_operands = 0 : i64, tpu.core_type = #tpu.core_type<tc>, window_params = [{transform_indices = @transform_0, window_bounds = array<i64: 2, 8, 128>}, {transform_indices = @transform_1, window_bounds = array<i64: 2, 8, 128>}, {pipeline_mode = #tpu.pipeline_mode<synchronous>, transform_indices = @transform_2, window_bounds = array<i64: 8, 8>}, {pipeline_mode = #tpu.pipeline_mode<synchronous>, transform_indices = @transform_3, window_bounds = array<i64: 8, 128, 128>}, {pipeline_mode = #tpu.pipeline_mode<synchronous>, transform_indices = @transform_4, window_bounds = array<i64: 15, 128>}, {pipeline_mode = #tpu.pipeline_mode<synchronous>, transform_indices = @transform_5, window_bounds = array<i64: 128, 128>}, {pipeline_mode = #tpu.pipeline_mode<synchronous>, transform_indices = @transform_6, window_bounds = array<i64: 1, 128>}, {pipeline_mode = #tpu.pipeline_mode<synchronous>, transform_indices = @transform_7, window_bounds = array<i64: 128, 128>}, {transform_indices = @transform_8, window_bounds = array<i64: 2, 8, 128>}]} {
    %c0 = arith.constant 0 : index
    %c0_0 = arith.constant 0 : index
    %c0_1 = arith.constant 0 : index
    %0 = vector.load %arg1[%c0, %c0_0, %c0_1] : memref<2x8x128xf32, #tpu.memory_space<vmem>>, vector<2x8x128xf32>
    %1 = vector.shape_cast %0 : vector<2x8x128xf32> to vector<16x128xf32>
    %c0_2 = arith.constant 0 : index
    %c0_3 = arith.constant 0 : index
    %c0_4 = arith.constant 0 : index
    %2 = vector.load %arg2[%c0_2, %c0_3, %c0_4] : memref<2x8x128xf32, #tpu.memory_space<vmem>>, vector<2x8x128xf32>
    %3 = vector.shape_cast %2 : vector<2x8x128xf32> to vector<16x128xf32>
    %c0_5 = arith.constant 0 : index
    %c0_6 = arith.constant 0 : index
    %4 = vector.load %arg3[%c0_5, %c0_6] : memref<8x8xf32, #tpu.memory_space<vmem>>, vector<8x8xf32>
    %c0_7 = arith.constant 0 : index
    %c0_8 = arith.constant 0 : index
    %5 = vector.load %arg5[%c0_7, %c0_8] : memref<15x128xf32, #tpu.memory_space<vmem>>, vector<15x128xf32>
    %6 = vector.extract_strided_slice %5 {offsets = [0, 0], sizes = [1, 128], strides = [1, 1]} : vector<15x128xf32> to vector<1x128xf32>
    %7 = vector.extract_strided_slice %5 {offsets = [1, 0], sizes = [1, 128], strides = [1, 1]} : vector<15x128xf32> to vector<1x128xf32>
    %8 = vector.extract_strided_slice %5 {offsets = [2, 0], sizes = [1, 128], strides = [1, 1]} : vector<15x128xf32> to vector<1x128xf32>
    %9 = vector.extract_strided_slice %5 {offsets = [3, 0], sizes = [1, 128], strides = [1, 1]} : vector<15x128xf32> to vector<1x128xf32>
    %10 = vector.extract_strided_slice %5 {offsets = [4, 0], sizes = [1, 128], strides = [1, 1]} : vector<15x128xf32> to vector<1x128xf32>
    %11 = vector.extract_strided_slice %5 {offsets = [5, 0], sizes = [1, 128], strides = [1, 1]} : vector<15x128xf32> to vector<1x128xf32>
    %12 = vector.extract_strided_slice %5 {offsets = [6, 0], sizes = [1, 128], strides = [1, 1]} : vector<15x128xf32> to vector<1x128xf32>
    %13 = vector.extract_strided_slice %5 {offsets = [7, 0], sizes = [1, 128], strides = [1, 1]} : vector<15x128xf32> to vector<1x128xf32>
    %14 = vector.extract_strided_slice %5 {offsets = [8, 0], sizes = [1, 128], strides = [1, 1]} : vector<15x128xf32> to vector<1x128xf32>
    %15 = vector.extract_strided_slice %5 {offsets = [9, 0], sizes = [1, 128], strides = [1, 1]} : vector<15x128xf32> to vector<1x128xf32>
    %16 = vector.extract_strided_slice %5 {offsets = [10, 0], sizes = [1, 128], strides = [1, 1]} : vector<15x128xf32> to vector<1x128xf32>
    %17 = vector.extract_strided_slice %5 {offsets = [11, 0], sizes = [1, 128], strides = [1, 1]} : vector<15x128xf32> to vector<1x128xf32>
    %18 = vector.extract_strided_slice %5 {offsets = [12, 0], sizes = [1, 128], strides = [1, 1]} : vector<15x128xf32> to vector<1x128xf32>
    %19 = vector.extract_strided_slice %5 {offsets = [13, 0], sizes = [1, 128], strides = [1, 1]} : vector<15x128xf32> to vector<1x128xf32>
    %20 = vector.extract_strided_slice %5 {offsets = [14, 0], sizes = [1, 128], strides = [1, 1]} : vector<15x128xf32> to vector<1x128xf32>
    %c0_9 = arith.constant 0 : index
    %c0_10 = arith.constant 0 : index
    %21 = vector.load %arg7[%c0_9, %c0_10] : memref<1x128xf32, #tpu.memory_space<vmem>>, vector<1x128xf32>
    %22 = tpu.iota {dimensions = array<i32: 1>} : vector<1x128xi32>
    %c32_i32 = arith.constant 32 : i32
    %23 = vector.broadcast %c32_i32 : i32 to vector<1x128xi32>
    %24 = arith.cmpi slt, %22, %23 : vector<1x128xi32>
    %25 = arith.extui %24 : vector<1x128xi1> to vector<1x128xi32>
    %26 = arith.sitofp %25 : vector<1x128xi32> to vector<1x128xf32>
    %c0_11 = arith.constant 0 : index
    %c0_12 = arith.constant 0 : index
    %c0_13 = arith.constant 0 : index
    %27 = vector.load %arg4[%c0_11, %c0_12, %c0_13] : memref<8x128x128xbf16, #tpu.memory_space<vmem>>, vector<1x128x128xbf16>
    %28 = vector.shape_cast %27 : vector<1x128x128xbf16> to vector<128x128xbf16>
    %c1 = arith.constant 1 : index
    %c0_14 = arith.constant 0 : index
    %c0_15 = arith.constant 0 : index
    %29 = vector.load %arg4[%c1, %c0_14, %c0_15] : memref<8x128x128xbf16, #tpu.memory_space<vmem>>, vector<1x128x128xbf16>
    %30 = vector.shape_cast %29 : vector<1x128x128xbf16> to vector<128x128xbf16>
    %c2 = arith.constant 2 : index
    %c0_16 = arith.constant 0 : index
    %c0_17 = arith.constant 0 : index
    %31 = vector.load %arg4[%c2, %c0_16, %c0_17] : memref<8x128x128xbf16, #tpu.memory_space<vmem>>, vector<1x128x128xbf16>
    %32 = vector.shape_cast %31 : vector<1x128x128xbf16> to vector<128x128xbf16>
    %c3 = arith.constant 3 : index
    %c0_18 = arith.constant 0 : index
    %c0_19 = arith.constant 0 : index
    %33 = vector.load %arg4[%c3, %c0_18, %c0_19] : memref<8x128x128xbf16, #tpu.memory_space<vmem>>, vector<1x128x128xbf16>
    %34 = vector.shape_cast %33 : vector<1x128x128xbf16> to vector<128x128xbf16>
    %35 = arith.truncf %1 : vector<16x128xf32> to vector<16x128xbf16>
    %cst = arith.constant dense<0.000000e+00> : vector<16x128xf32>
    %36 = tpu.matmul %35, %28, %cst {dimension_numbers = #tpu.dot_dimension_numbers<[1], [0], [0], [1], [0, 0, 1, 1], [], []>} : vector<16x128xbf16>, vector<128x128xbf16>, vector<16x128xf32> -> vector<16x128xf32>
    %37 = vector.broadcast %6 : vector<1x128xf32> to vector<16x128xf32>
    %38 = arith.addf %36, %37 : vector<16x128xf32>
    %cst_20 = arith.constant 0.353553385 : f32
    %39 = vector.broadcast %cst_20 : f32 to vector<16x128xf32>
    %40 = arith.mulf %38, %39 : vector<16x128xf32>
    %cst_21 = arith.constant dense<0.000000e+00> : vector<16x128xf32>
    %41 = tpu.matmul %35, %30, %cst_21 {dimension_numbers = #tpu.dot_dimension_numbers<[1], [0], [0], [1], [0, 0, 1, 1], [], []>} : vector<16x128xbf16>, vector<128x128xbf16>, vector<16x128xf32> -> vector<16x128xf32>
    %42 = vector.broadcast %7 : vector<1x128xf32> to vector<16x128xf32>
    %43 = arith.addf %41, %42 : vector<16x128xf32>
    %cst_22 = arith.constant dense<0.000000e+00> : vector<16x128xf32>
    %44 = tpu.matmul %35, %32, %cst_22 {dimension_numbers = #tpu.dot_dimension_numbers<[1], [0], [0], [1], [0, 0, 1, 1], [], []>} : vector<16x128xbf16>, vector<128x128xbf16>, vector<16x128xf32> -> vector<16x128xf32>
    %45 = vector.broadcast %8 : vector<1x128xf32> to vector<16x128xf32>
    %46 = arith.addf %44, %45 : vector<16x128xf32>
    %47 = arith.truncf %40 : vector<16x128xf32> to vector<16x128xbf16>
    %48 = arith.truncf %43 : vector<16x128xf32> to vector<16x128xbf16>
    %49 = arith.truncf %46 : vector<16x128xf32> to vector<16x128xbf16>
    %50 = vector.extract_strided_slice %47 {offsets = [0, 0], sizes = [8, 128], strides = [1, 1]} : vector<16x128xbf16> to vector<8x128xbf16>
    %51 = vector.shape_cast %50 : vector<8x128xbf16> to vector<8x4x32xbf16>
    %52 = vector.extract_strided_slice %48 {offsets = [0, 0], sizes = [8, 128], strides = [1, 1]} : vector<16x128xbf16> to vector<8x128xbf16>
    %53 = vector.shape_cast %52 : vector<8x128xbf16> to vector<8x4x32xbf16>
    %54 = vector.extract_strided_slice %49 {offsets = [0, 0], sizes = [8, 128], strides = [1, 1]} : vector<16x128xbf16> to vector<8x128xbf16>
    %55 = vector.shape_cast %54 : vector<8x128xbf16> to vector<8x4x32xbf16>
    "tpu.trace_start"() <{level = 10 : i32, message = "thd,shd->hts"}> : () -> ()
    %cst_23 = arith.constant dense<0.000000e+00> : vector<4x8x8xf32>
    %56 = tpu.matmul %51, %53, %cst_23 {dimension_numbers = #tpu.dot_dimension_numbers<[2], [2], [0], [0], [0, 1, 0, 0, 1, 0], [1], [1]>} : vector<8x4x32xbf16>, vector<8x4x32xbf16>, vector<4x8x8xf32> -> vector<4x8x8xf32>
    "tpu.trace_stop"() : () -> ()
    %57 = vector.shape_cast %4 : vector<8x8xf32> to vector<1x8x8xf32>
    %58 = vector.broadcast %57 : vector<1x8x8xf32> to vector<4x8x8xf32>
    %59 = arith.addf %56, %58 : vector<4x8x8xf32>
    %cst_24 = arith.constant dense<0xFF800000> : vector<4x8xf32>
    %60 = vector.multi_reduction <maximumf>, %59, %cst_24 [2] : vector<4x8x8xf32> to vector<4x8xf32>
    %61 = vector.shape_cast %60 : vector<4x8xf32> to vector<4x8x1xf32>
    %62 = vector.broadcast %61 : vector<4x8x1xf32> to vector<4x8x8xf32>
    %63 = arith.subf %59, %62 : vector<4x8x8xf32>
    %64 = math.exp %63 : vector<4x8x8xf32>
    %cst_25 = arith.constant dense<0.000000e+00> : vector<4x8xf32>
    %65 = vector.multi_reduction <add>, %64, %cst_25 [2] : vector<4x8x8xf32> to vector<4x8xf32>
    %66 = vector.shape_cast %65 : vector<4x8xf32> to vector<4x8x1xf32>
    %67 = tpu.reciprocal %66 {approx = true} : vector<4x8x1xf32> -> vector<4x8x1xf32>
    %68 = vector.broadcast %67 : vector<4x8x1xf32> to vector<4x8x8xf32>
    %69 = arith.mulf %64, %68 : vector<4x8x8xf32>
    %70 = arith.truncf %69 : vector<4x8x8xf32> to vector<4x8x8xbf16>
    "tpu.trace_start"() <{level = 10 : i32, message = "hts,shd->thd"}> : () -> ()
    %cst_26 = arith.constant dense<0.000000e+00> : vector<4x32x8xf32>
    %71 = tpu.matmul %55, %70, %cst_26 {dimension_numbers = #tpu.dot_dimension_numbers<[0], [2], [2], [1], [0, 1, 0, 2, 1, 1], [1], [0]>} : vector<8x4x32xbf16>, vector<4x8x8xbf16>, vector<4x32x8xf32> -> vector<4x32x8xf32>
    %72 = tpu.transpose %71, [2, 0, 1] : vector<4x32x8xf32> -> vector<8x4x32xf32>
    "tpu.trace_stop"() : () -> ()
    %73 = vector.shape_cast %72 : vector<8x4x32xf32> to vector<8x128xf32>
    %74 = vector.extract_strided_slice %47 {offsets = [8, 0], sizes = [8, 128], strides = [1, 1]} : vector<16x128xbf16> to vector<8x128xbf16>
    %75 = vector.shape_cast %74 : vector<8x128xbf16> to vector<8x4x32xbf16>
    %76 = vector.extract_strided_slice %48 {offsets = [8, 0], sizes = [8, 128], strides = [1, 1]} : vector<16x128xbf16> to vector<8x128xbf16>
    %77 = vector.shape_cast %76 : vector<8x128xbf16> to vector<8x4x32xbf16>
    %78 = vector.extract_strided_slice %49 {offsets = [8, 0], sizes = [8, 128], strides = [1, 1]} : vector<16x128xbf16> to vector<8x128xbf16>
    %79 = vector.shape_cast %78 : vector<8x128xbf16> to vector<8x4x32xbf16>
    "tpu.trace_start"() <{level = 10 : i32, message = "thd,shd->hts"}> : () -> ()
    %cst_27 = arith.constant dense<0.000000e+00> : vector<4x8x8xf32>
    %80 = tpu.matmul %75, %77, %cst_27 {dimension_numbers = #tpu.dot_dimension_numbers<[2], [2], [0], [0], [0, 1, 0, 0, 1, 0], [1], [1]>} : vector<8x4x32xbf16>, vector<8x4x32xbf16>, vector<4x8x8xf32> -> vector<4x8x8xf32>
    "tpu.trace_stop"() : () -> ()
    %81 = vector.shape_cast %4 : vector<8x8xf32> to vector<1x8x8xf32>
    %82 = vector.broadcast %81 : vector<1x8x8xf32> to vector<4x8x8xf32>
    %83 = arith.addf %80, %82 : vector<4x8x8xf32>
    %cst_28 = arith.constant dense<0xFF800000> : vector<4x8xf32>
    %84 = vector.multi_reduction <maximumf>, %83, %cst_28 [2] : vector<4x8x8xf32> to vector<4x8xf32>
    %85 = vector.shape_cast %84 : vector<4x8xf32> to vector<4x8x1xf32>
    %86 = vector.broadcast %85 : vector<4x8x1xf32> to vector<4x8x8xf32>
    %87 = arith.subf %83, %86 : vector<4x8x8xf32>
    %88 = math.exp %87 : vector<4x8x8xf32>
    %cst_29 = arith.constant dense<0.000000e+00> : vector<4x8xf32>
    %89 = vector.multi_reduction <add>, %88, %cst_29 [2] : vector<4x8x8xf32> to vector<4x8xf32>
    %90 = vector.shape_cast %89 : vector<4x8xf32> to vector<4x8x1xf32>
    %91 = tpu.reciprocal %90 {approx = true} : vector<4x8x1xf32> -> vector<4x8x1xf32>
    %92 = vector.broadcast %91 : vector<4x8x1xf32> to vector<4x8x8xf32>
    %93 = arith.mulf %88, %92 : vector<4x8x8xf32>
    %94 = arith.truncf %93 : vector<4x8x8xf32> to vector<4x8x8xbf16>
    "tpu.trace_start"() <{level = 10 : i32, message = "hts,shd->thd"}> : () -> ()
    %cst_30 = arith.constant dense<0.000000e+00> : vector<4x32x8xf32>
    %95 = tpu.matmul %79, %94, %cst_30 {dimension_numbers = #tpu.dot_dimension_numbers<[0], [2], [2], [1], [0, 1, 0, 2, 1, 1], [1], [0]>} : vector<8x4x32xbf16>, vector<4x8x8xbf16>, vector<4x32x8xf32> -> vector<4x32x8xf32>
    %96 = tpu.transpose %95, [2, 0, 1] : vector<4x32x8xf32> -> vector<8x4x32xf32>
    "tpu.trace_stop"() : () -> ()
    %97 = vector.shape_cast %96 : vector<8x4x32xf32> to vector<8x128xf32>
    %98 = tpu.concatenate %73, %97 in 0 : vector<8x128xf32>, vector<8x128xf32> -> vector<16x128xf32>
    %99 = arith.truncf %98 : vector<16x128xf32> to vector<16x128xbf16>
    %cst_31 = arith.constant dense<0.000000e+00> : vector<16x128xf32>
    %100 = tpu.matmul %99, %34, %cst_31 {dimension_numbers = #tpu.dot_dimension_numbers<[1], [0], [0], [1], [0, 0, 1, 1], [], []>} : vector<16x128xbf16>, vector<128x128xbf16>, vector<16x128xf32> -> vector<16x128xf32>
    %101 = vector.broadcast %9 : vector<1x128xf32> to vector<16x128xf32>
    %102 = arith.addf %100, %101 : vector<16x128xf32>
    %103 = arith.addf %102, %1 : vector<16x128xf32>
    %cst_32 = arith.constant dense<0.000000e+00> : vector<16xf32>
    %104 = vector.multi_reduction <add>, %103, %cst_32 [1] : vector<16x128xf32> to vector<16xf32>
    %105 = vector.shape_cast %104 : vector<16xf32> to vector<16x1xf32>
    %cst_33 = arith.constant 3.125000e-02 : f32
    %106 = vector.broadcast %cst_33 : f32 to vector<16x1xf32>
    %107 = arith.mulf %105, %106 : vector<16x1xf32>
    %108 = vector.broadcast %107 : vector<16x1xf32> to vector<16x128xf32>
    %109 = arith.subf %103, %108 : vector<16x128xf32>
    %110 = vector.broadcast %26 : vector<1x128xf32> to vector<16x128xf32>
    %111 = arith.mulf %109, %110 : vector<16x128xf32>
    %112 = arith.mulf %111, %111 : vector<16x128xf32>
    %cst_34 = arith.constant dense<0.000000e+00> : vector<16xf32>
    %113 = vector.multi_reduction <add>, %112, %cst_34 [1] : vector<16x128xf32> to vector<16xf32>
    %114 = vector.shape_cast %113 : vector<16xf32> to vector<16x1xf32>
    %cst_35 = arith.constant 3.125000e-02 : f32
    %115 = vector.broadcast %cst_35 : f32 to vector<16x1xf32>
    %116 = arith.mulf %114, %115 : vector<16x1xf32>
    %cst_36 = arith.constant 9.99999974E-6 : f32
    %117 = vector.broadcast %cst_36 : f32 to vector<16x1xf32>
    %118 = arith.addf %116, %117 : vector<16x1xf32>
    %119 = math.rsqrt %118 : vector<16x1xf32>
    %120 = vector.broadcast %119 : vector<16x1xf32> to vector<16x128xf32>
    %121 = arith.mulf %111, %120 : vector<16x128xf32>
    %122 = vector.broadcast %14 : vector<1x128xf32> to vector<16x128xf32>
    %123 = arith.mulf %121, %122 : vector<16x128xf32>
    %124 = vector.broadcast %15 : vector<1x128xf32> to vector<16x128xf32>
    %125 = arith.addf %123, %124 : vector<16x128xf32>
    %c4 = arith.constant 4 : index
    %c0_37 = arith.constant 0 : index
    %c0_38 = arith.constant 0 : index
    %126 = vector.load %arg4[%c4, %c0_37, %c0_38] : memref<8x128x128xbf16, #tpu.memory_space<vmem>>, vector<1x128x128xbf16>
    %127 = vector.shape_cast %126 : vector<1x128x128xbf16> to vector<128x128xbf16>
    %c5 = arith.constant 5 : index
    %c0_39 = arith.constant 0 : index
    %c0_40 = arith.constant 0 : index
    %128 = vector.load %arg4[%c5, %c0_39, %c0_40] : memref<8x128x128xbf16, #tpu.memory_space<vmem>>, vector<1x128x128xbf16>
    %129 = vector.shape_cast %128 : vector<1x128x128xbf16> to vector<128x128xbf16>
    %c6 = arith.constant 6 : index
    %c0_41 = arith.constant 0 : index
    %c0_42 = arith.constant 0 : index
    %130 = vector.load %arg4[%c6, %c0_41, %c0_42] : memref<8x128x128xbf16, #tpu.memory_space<vmem>>, vector<1x128x128xbf16>
    %131 = vector.shape_cast %130 : vector<1x128x128xbf16> to vector<128x128xbf16>
    %c7 = arith.constant 7 : index
    %c0_43 = arith.constant 0 : index
    %c0_44 = arith.constant 0 : index
    %132 = vector.load %arg4[%c7, %c0_43, %c0_44] : memref<8x128x128xbf16, #tpu.memory_space<vmem>>, vector<1x128x128xbf16>
    %133 = vector.shape_cast %132 : vector<1x128x128xbf16> to vector<128x128xbf16>
    %134 = arith.truncf %125 : vector<16x128xf32> to vector<16x128xbf16>
    %135 = arith.truncf %3 : vector<16x128xf32> to vector<16x128xbf16>
    %cst_45 = arith.constant dense<0.000000e+00> : vector<16x128xf32>
    %136 = tpu.matmul %134, %127, %cst_45 {dimension_numbers = #tpu.dot_dimension_numbers<[1], [0], [0], [1], [0, 0, 1, 1], [], []>} : vector<16x128xbf16>, vector<128x128xbf16>, vector<16x128xf32> -> vector<16x128xf32>
    %137 = vector.broadcast %10 : vector<1x128xf32> to vector<16x128xf32>
    %138 = arith.addf %136, %137 : vector<16x128xf32>
    %cst_46 = arith.constant 0.353553385 : f32
    %139 = vector.broadcast %cst_46 : f32 to vector<16x128xf32>
    %140 = arith.mulf %138, %139 : vector<16x128xf32>
    %cst_47 = arith.constant dense<0.000000e+00> : vector<16x128xf32>
    %141 = tpu.matmul %135, %129, %cst_47 {dimension_numbers = #tpu.dot_dimension_numbers<[1], [0], [0], [1], [0, 0, 1, 1], [], []>} : vector<16x128xbf16>, vector<128x128xbf16>, vector<16x128xf32> -> vector<16x128xf32>
    %142 = vector.broadcast %11 : vector<1x128xf32> to vector<16x128xf32>
    %143 = arith.addf %141, %142 : vector<16x128xf32>
    %cst_48 = arith.constant dense<0.000000e+00> : vector<16x128xf32>
    %144 = tpu.matmul %135, %131, %cst_48 {dimension_numbers = #tpu.dot_dimension_numbers<[1], [0], [0], [1], [0, 0, 1, 1], [], []>} : vector<16x128xbf16>, vector<128x128xbf16>, vector<16x128xf32> -> vector<16x128xf32>
    %145 = vector.broadcast %12 : vector<1x128xf32> to vector<16x128xf32>
    %146 = arith.addf %144, %145 : vector<16x128xf32>
    %147 = arith.truncf %140 : vector<16x128xf32> to vector<16x128xbf16>
    %148 = arith.truncf %143 : vector<16x128xf32> to vector<16x128xbf16>
    %149 = arith.truncf %146 : vector<16x128xf32> to vector<16x128xbf16>
    %150 = vector.extract_strided_slice %147 {offsets = [0, 0], sizes = [8, 128], strides = [1, 1]} : vector<16x128xbf16> to vector<8x128xbf16>
    %151 = vector.shape_cast %150 : vector<8x128xbf16> to vector<8x4x32xbf16>
    %152 = vector.extract_strided_slice %148 {offsets = [0, 0], sizes = [8, 128], strides = [1, 1]} : vector<16x128xbf16> to vector<8x128xbf16>
    %153 = vector.shape_cast %152 : vector<8x128xbf16> to vector<8x4x32xbf16>
    %154 = vector.extract_strided_slice %149 {offsets = [0, 0], sizes = [8, 128], strides = [1, 1]} : vector<16x128xbf16> to vector<8x128xbf16>
    %155 = vector.shape_cast %154 : vector<8x128xbf16> to vector<8x4x32xbf16>
    "tpu.trace_start"() <{level = 10 : i32, message = "thd,shd->hts"}> : () -> ()
    %cst_49 = arith.constant dense<0.000000e+00> : vector<4x8x8xf32>
    %156 = tpu.matmul %151, %153, %cst_49 {dimension_numbers = #tpu.dot_dimension_numbers<[2], [2], [0], [0], [0, 1, 0, 0, 1, 0], [1], [1]>} : vector<8x4x32xbf16>, vector<8x4x32xbf16>, vector<4x8x8xf32> -> vector<4x8x8xf32>
    "tpu.trace_stop"() : () -> ()
    %cst_50 = arith.constant dense<0xFF800000> : vector<4x8xf32>
    %157 = vector.multi_reduction <maximumf>, %156, %cst_50 [2] : vector<4x8x8xf32> to vector<4x8xf32>
    %158 = vector.shape_cast %157 : vector<4x8xf32> to vector<4x8x1xf32>
    %159 = vector.broadcast %158 : vector<4x8x1xf32> to vector<4x8x8xf32>
    %160 = arith.subf %156, %159 : vector<4x8x8xf32>
    %161 = math.exp %160 : vector<4x8x8xf32>
    %cst_51 = arith.constant dense<0.000000e+00> : vector<4x8xf32>
    %162 = vector.multi_reduction <add>, %161, %cst_51 [2] : vector<4x8x8xf32> to vector<4x8xf32>
    %163 = vector.shape_cast %162 : vector<4x8xf32> to vector<4x8x1xf32>
    %164 = tpu.reciprocal %163 {approx = true} : vector<4x8x1xf32> -> vector<4x8x1xf32>
    %165 = vector.broadcast %164 : vector<4x8x1xf32> to vector<4x8x8xf32>
    %166 = arith.mulf %161, %165 : vector<4x8x8xf32>
    %167 = arith.truncf %166 : vector<4x8x8xf32> to vector<4x8x8xbf16>
    "tpu.trace_start"() <{level = 10 : i32, message = "hts,shd->thd"}> : () -> ()
    %cst_52 = arith.constant dense<0.000000e+00> : vector<4x32x8xf32>
    %168 = tpu.matmul %155, %167, %cst_52 {dimension_numbers = #tpu.dot_dimension_numbers<[0], [2], [2], [1], [0, 1, 0, 2, 1, 1], [1], [0]>} : vector<8x4x32xbf16>, vector<4x8x8xbf16>, vector<4x32x8xf32> -> vector<4x32x8xf32>
    %169 = tpu.transpose %168, [2, 0, 1] : vector<4x32x8xf32> -> vector<8x4x32xf32>
    "tpu.trace_stop"() : () -> ()
    %170 = vector.shape_cast %169 : vector<8x4x32xf32> to vector<8x128xf32>
    %171 = vector.extract_strided_slice %147 {offsets = [8, 0], sizes = [8, 128], strides = [1, 1]} : vector<16x128xbf16> to vector<8x128xbf16>
    %172 = vector.shape_cast %171 : vector<8x128xbf16> to vector<8x4x32xbf16>
    %173 = vector.extract_strided_slice %148 {offsets = [8, 0], sizes = [8, 128], strides = [1, 1]} : vector<16x128xbf16> to vector<8x128xbf16>
    %174 = vector.shape_cast %173 : vector<8x128xbf16> to vector<8x4x32xbf16>
    %175 = vector.extract_strided_slice %149 {offsets = [8, 0], sizes = [8, 128], strides = [1, 1]} : vector<16x128xbf16> to vector<8x128xbf16>
    %176 = vector.shape_cast %175 : vector<8x128xbf16> to vector<8x4x32xbf16>
    "tpu.trace_start"() <{level = 10 : i32, message = "thd,shd->hts"}> : () -> ()
    %cst_53 = arith.constant dense<0.000000e+00> : vector<4x8x8xf32>
    %177 = tpu.matmul %172, %174, %cst_53 {dimension_numbers = #tpu.dot_dimension_numbers<[2], [2], [0], [0], [0, 1, 0, 0, 1, 0], [1], [1]>} : vector<8x4x32xbf16>, vector<8x4x32xbf16>, vector<4x8x8xf32> -> vector<4x8x8xf32>
    "tpu.trace_stop"() : () -> ()
    %cst_54 = arith.constant dense<0xFF800000> : vector<4x8xf32>
    %178 = vector.multi_reduction <maximumf>, %177, %cst_54 [2] : vector<4x8x8xf32> to vector<4x8xf32>
    %179 = vector.shape_cast %178 : vector<4x8xf32> to vector<4x8x1xf32>
    %180 = vector.broadcast %179 : vector<4x8x1xf32> to vector<4x8x8xf32>
    %181 = arith.subf %177, %180 : vector<4x8x8xf32>
    %182 = math.exp %181 : vector<4x8x8xf32>
    %cst_55 = arith.constant dense<0.000000e+00> : vector<4x8xf32>
    %183 = vector.multi_reduction <add>, %182, %cst_55 [2] : vector<4x8x8xf32> to vector<4x8xf32>
    %184 = vector.shape_cast %183 : vector<4x8xf32> to vector<4x8x1xf32>
    %185 = tpu.reciprocal %184 {approx = true} : vector<4x8x1xf32> -> vector<4x8x1xf32>
    %186 = vector.broadcast %185 : vector<4x8x1xf32> to vector<4x8x8xf32>
    %187 = arith.mulf %182, %186 : vector<4x8x8xf32>
    %188 = arith.truncf %187 : vector<4x8x8xf32> to vector<4x8x8xbf16>
    "tpu.trace_start"() <{level = 10 : i32, message = "hts,shd->thd"}> : () -> ()
    %cst_56 = arith.constant dense<0.000000e+00> : vector<4x32x8xf32>
    %189 = tpu.matmul %176, %188, %cst_56 {dimension_numbers = #tpu.dot_dimension_numbers<[0], [2], [2], [1], [0, 1, 0, 2, 1, 1], [1], [0]>} : vector<8x4x32xbf16>, vector<4x8x8xbf16>, vector<4x32x8xf32> -> vector<4x32x8xf32>
    %190 = tpu.transpose %189, [2, 0, 1] : vector<4x32x8xf32> -> vector<8x4x32xf32>
    "tpu.trace_stop"() : () -> ()
    %191 = vector.shape_cast %190 : vector<8x4x32xf32> to vector<8x128xf32>
    %192 = tpu.concatenate %170, %191 in 0 : vector<8x128xf32>, vector<8x128xf32> -> vector<16x128xf32>
    %193 = arith.truncf %192 : vector<16x128xf32> to vector<16x128xbf16>
    %cst_57 = arith.constant dense<0.000000e+00> : vector<16x128xf32>
    %194 = tpu.matmul %193, %133, %cst_57 {dimension_numbers = #tpu.dot_dimension_numbers<[1], [0], [0], [1], [0, 0, 1, 1], [], []>} : vector<16x128xbf16>, vector<128x128xbf16>, vector<16x128xf32> -> vector<16x128xf32>
    %195 = vector.broadcast %13 : vector<1x128xf32> to vector<16x128xf32>
    %196 = arith.addf %194, %195 : vector<16x128xf32>
    %197 = arith.addf %196, %125 : vector<16x128xf32>
    %cst_58 = arith.constant dense<0.000000e+00> : vector<16xf32>
    %198 = vector.multi_reduction <add>, %197, %cst_58 [1] : vector<16x128xf32> to vector<16xf32>
    %199 = vector.shape_cast %198 : vector<16xf32> to vector<16x1xf32>
    %cst_59 = arith.constant 3.125000e-02 : f32
    %200 = vector.broadcast %cst_59 : f32 to vector<16x1xf32>
    %201 = arith.mulf %199, %200 : vector<16x1xf32>
    %202 = vector.broadcast %201 : vector<16x1xf32> to vector<16x128xf32>
    %203 = arith.subf %197, %202 : vector<16x128xf32>
    %204 = vector.broadcast %26 : vector<1x128xf32> to vector<16x128xf32>
    %205 = arith.mulf %203, %204 : vector<16x128xf32>
    %206 = arith.mulf %205, %205 : vector<16x128xf32>
    %cst_60 = arith.constant dense<0.000000e+00> : vector<16xf32>
    %207 = vector.multi_reduction <add>, %206, %cst_60 [1] : vector<16x128xf32> to vector<16xf32>
    %208 = vector.shape_cast %207 : vector<16xf32> to vector<16x1xf32>
    %cst_61 = arith.constant 3.125000e-02 : f32
    %209 = vector.broadcast %cst_61 : f32 to vector<16x1xf32>
    %210 = arith.mulf %208, %209 : vector<16x1xf32>
    %cst_62 = arith.constant 9.99999974E-6 : f32
    %211 = vector.broadcast %cst_62 : f32 to vector<16x1xf32>
    %212 = arith.addf %210, %211 : vector<16x1xf32>
    %213 = math.rsqrt %212 : vector<16x1xf32>
    %214 = vector.broadcast %213 : vector<16x1xf32> to vector<16x128xf32>
    %215 = arith.mulf %205, %214 : vector<16x128xf32>
    %216 = vector.broadcast %16 : vector<1x128xf32> to vector<16x128xf32>
    %217 = arith.mulf %215, %216 : vector<16x128xf32>
    %218 = vector.broadcast %17 : vector<1x128xf32> to vector<16x128xf32>
    %219 = arith.addf %217, %218 : vector<16x128xf32>
    %220 = arith.truncf %219 : vector<16x128xf32> to vector<16x128xbf16>
    %c0_63 = arith.constant 0 : index
    %c0_64 = arith.constant 0 : index
    %221 = vector.load %arg6[%c0_63, %c0_64] : memref<128x128xbf16, #tpu.memory_space<vmem>>, vector<128x128xbf16>
    %cst_65 = arith.constant dense<0.000000e+00> : vector<16x128xf32>
    %222 = tpu.matmul %220, %221, %cst_65 {dimension_numbers = #tpu.dot_dimension_numbers<[1], [0], [0], [1], [0, 0, 1, 1], [], []>} : vector<16x128xbf16>, vector<128x128xbf16>, vector<16x128xf32> -> vector<16x128xf32>
    %223 = vector.broadcast %21 : vector<1x128xf32> to vector<16x128xf32>
    %224 = arith.addf %222, %223 : vector<16x128xf32>
    %cst_66 = arith.constant 0.000000e+00 : f32
    %225 = vector.broadcast %cst_66 : f32 to vector<16x128xf32>
    %226 = arith.maximumf %224, %225 : vector<16x128xf32>
    %227 = arith.truncf %226 : vector<16x128xf32> to vector<16x128xbf16>
    %c0_67 = arith.constant 0 : index
    %c0_68 = arith.constant 0 : index
    %228 = vector.load %arg8[%c0_67, %c0_68] : memref<128x128xbf16, #tpu.memory_space<vmem>>, vector<128x128xbf16>
    %cst_69 = arith.constant dense<0.000000e+00> : vector<16x128xf32>
    %229 = tpu.matmul %227, %228, %cst_69 {dimension_numbers = #tpu.dot_dimension_numbers<[1], [0], [0], [1], [0, 0, 1, 1], [], []>} : vector<16x128xbf16>, vector<128x128xbf16>, vector<16x128xf32> -> vector<16x128xf32>
    %230 = vector.broadcast %20 : vector<1x128xf32> to vector<16x128xf32>
    %231 = arith.addf %229, %230 : vector<16x128xf32>
    %232 = arith.addf %231, %219 : vector<16x128xf32>
    %cst_70 = arith.constant dense<0.000000e+00> : vector<16xf32>
    %233 = vector.multi_reduction <add>, %232, %cst_70 [1] : vector<16x128xf32> to vector<16xf32>
    %234 = vector.shape_cast %233 : vector<16xf32> to vector<16x1xf32>
    %cst_71 = arith.constant 3.125000e-02 : f32
    %235 = vector.broadcast %cst_71 : f32 to vector<16x1xf32>
    %236 = arith.mulf %234, %235 : vector<16x1xf32>
    %237 = vector.broadcast %236 : vector<16x1xf32> to vector<16x128xf32>
    %238 = arith.subf %232, %237 : vector<16x128xf32>
    %239 = vector.broadcast %26 : vector<1x128xf32> to vector<16x128xf32>
    %240 = arith.mulf %238, %239 : vector<16x128xf32>
    %241 = arith.mulf %240, %240 : vector<16x128xf32>
    %cst_72 = arith.constant dense<0.000000e+00> : vector<16xf32>
    %242 = vector.multi_reduction <add>, %241, %cst_72 [1] : vector<16x128xf32> to vector<16xf32>
    %243 = vector.shape_cast %242 : vector<16xf32> to vector<16x1xf32>
    %cst_73 = arith.constant 3.125000e-02 : f32
    %244 = vector.broadcast %cst_73 : f32 to vector<16x1xf32>
    %245 = arith.mulf %243, %244 : vector<16x1xf32>
    %cst_74 = arith.constant 9.99999974E-6 : f32
    %246 = vector.broadcast %cst_74 : f32 to vector<16x1xf32>
    %247 = arith.addf %245, %246 : vector<16x1xf32>
    %248 = math.rsqrt %247 : vector<16x1xf32>
    %249 = vector.broadcast %248 : vector<16x1xf32> to vector<16x128xf32>
    %250 = arith.mulf %240, %249 : vector<16x128xf32>
    %251 = vector.broadcast %18 : vector<1x128xf32> to vector<16x128xf32>
    %252 = arith.mulf %250, %251 : vector<16x128xf32>
    %253 = vector.broadcast %19 : vector<1x128xf32> to vector<16x128xf32>
    %254 = arith.addf %252, %253 : vector<16x128xf32>
    %255 = vector.shape_cast %254 : vector<16x128xf32> to vector<2x8x128xf32>
    %c0_75 = arith.constant 0 : index
    %c0_76 = arith.constant 0 : index
    %c0_77 = arith.constant 0 : index
    %256 = vector.load %arg9[%c0_75, %c0_76, %c0_77] : memref<2x8x128xf32, #tpu.memory_space<vmem>>, vector<2x8x128xf32>
    tpu.vector_store %arg9[%c0_75, %c0_76, %c0_77], %255 {strides = array<i32>} : memref<2x8x128xf32, #tpu.memory_space<vmem>>, vector<2x8x128xf32>,
    return
  }
  func.func @transform_0(%arg0: i32) -> (i32, i32, i32) {
    %c0_i32 = arith.constant 0 : i32
    %c0_i32_0 = arith.constant 0 : i32
    %c0_i32_1 = arith.constant 0 : i32
    return %arg0, %c0_i32, %c0_i32_0 : i32, i32, i32
  }
  func.func @transform_1(%arg0: i32) -> (i32, i32, i32) {
    %c0_i32 = arith.constant 0 : i32
    %c0_i32_0 = arith.constant 0 : i32
    %c0_i32_1 = arith.constant 0 : i32
    return %arg0, %c0_i32, %c0_i32_0 : i32, i32, i32
  }
  func.func @transform_2(%arg0: i32) -> (i32, i32) {
    %c0_i32 = arith.constant 0 : i32
    %c0_i32_0 = arith.constant 0 : i32
    %c0_i32_1 = arith.constant 0 : i32
    return %c0_i32, %c0_i32_0 : i32, i32
  }
  func.func @transform_3(%arg0: i32) -> (i32, i32, i32) {
    %c0_i32 = arith.constant 0 : i32
    %c0_i32_0 = arith.constant 0 : i32
    %c0_i32_1 = arith.constant 0 : i32
    %c0_i32_2 = arith.constant 0 : i32
    return %c0_i32, %c0_i32_0, %c0_i32_1 : i32, i32, i32
  }
  func.func @transform_4(%arg0: i32) -> (i32, i32) {
    %c0_i32 = arith.constant 0 : i32
    %c0_i32_0 = arith.constant 0 : i32
    %c0_i32_1 = arith.constant 0 : i32
    return %c0_i32, %c0_i32_0 : i32, i32
  }
  func.func @transform_5(%arg0: i32) -> (i32, i32) {
    %c0_i32 = arith.constant 0 : i32
    %c0_i32_0 = arith.constant 0 : i32
    %c0_i32_1 = arith.constant 0 : i32
    return %c0_i32, %c0_i32_0 : i32, i32
  }
  func.func @transform_6(%arg0: i32) -> (i32, i32) {
    %c0_i32 = arith.constant 0 : i32
    %c0_i32_0 = arith.constant 0 : i32
    %c0_i32_1 = arith.constant 0 : i32
    return %c0_i32, %c0_i32_0 : i32, i32
  }
  func.func @transform_7(%arg0: i32) -> (i32, i32) {
    %c0_i32 = arith.constant 0 : i32
    %c0_i32_0 = arith.constant 0 : i32
    %c0_i32_1 = arith.constant 0 : i32
    return %c0_i32, %c0_i32_0 : i32, i32
  }
  func.func @transform_8(%arg0: i32) -> (i32, i32, i32) {
    %c0_i32 = arith.constant 0 : i32
    %c0_i32_0 = arith.constant 0 : i32
    %c0_i32_1 = arith.constant 0 : i32
    return %arg0, %c0_i32, %c0_i32_0 : i32, i32, i32
  }
}

</mosaic_0001>

<bundles_post_ra>
// kernel: tpu_custom_call.1
= control target key start
LH: loop header
LB: loop body
LE: loop exit
PB: predicated region body
PF: predicated region fallthrough
CT: control target
= control target key end

     0   :  { %13 = vsyncpa [#allocation3], 0  ;;  %s5314_s0 = inlined_call_operand.hbm [shape: f32[2,8,128], index: 0, kind: input, shape index: {}]   ;;  %s5315_s1 = inlined_call_operand.hbm [shape: f32[2,8,128], index: 1, kind: input, shape index: {}]   ;;  %s5316_s2 = inlined_call_operand.hbm [shape: f32[8,8], index: 2, kind: input, shape index: {}]   ;;  %s5317_s3 = inlined_call_operand.hbm [shape: bf16[8,128,128], index: 3, kind: input, shape index: {}]   ;;  %s5318_s4 = inlined_call_operand.hbm [shape: f32[15,128], index: 4, kind: input, shape index: {}]   ;;  %s5319_s5 = inlined_call_operand.hbm [shape: bf16[128,128], index: 5, kind: input, shape index: {}]   ;;  %s5320_s6 = inlined_call_operand.vmem [shape: f32[1,128], index: 6, kind: input, shape index: {}]   ;;  %s5321_s7 = inlined_call_operand.hbm [shape: bf16[128,128], index: 7, kind: input, shape index: {}]   ;;  %s5322_s8 = inlined_call_operand.hbm [shape: f32[2,8,128], index: 8, kind: output, shape index: {}]  }
   0x1   :  { %14 = vsyncpa [#allocation6], 0 }
   0x2   :  { %15 = vsyncpa [#allocation9], 0 }
   0x3   :  { %16 = vsyncpa [#allocation12], 0 }
   0x4   :  { %17 = vsyncpa [#allocation4], 0  ;;  %s35_s29 = sshll.u32 %s5315_s1, 4  ;;  %s4647_s30 = smov [#allocation5]   ;;  %s36_s29 = int_to_ptr.hbm [resolvable:$true] %s35_s29 }
   0x5   :  { %s37_s9 = sshll.u32 %s4647_s30, 4  ;;  %s59_s12 = sshll.u32 %s5317_s3, 4  ;;  %s38_s9 = int_to_ptr.vmem [resolvable:$true] %s37_s9  ;;  %s60_s12 = int_to_ptr.hbm [resolvable:$true] %s59_s12 }
   0x6   :  { %s4648_s13 = smov 128   ;;  %s4649_s14 = smov 8  }
   0x7   :  { %43 = dma.hbm_to_vmem [thread:$0]  %s36_s29, 256, %s38_s9, [#allocation6], %s4648_s13, %s4648_s13, %s4649_s14  }
   0x8   :  { %s4650_s15 = smov [#allocation8]   ;;  %s4651_s17 = smov 64  }
   0x9   :  { %s61_s16 = sshll.u32 %s4650_s15, 4  ;;  %s4652_s1 = smov 4   ;;  %s62_s16 = int_to_ptr.vmem [resolvable:$true] %s61_s16 }
   0xa   :  { %67 = dma.hbm_to_vmem [thread:$0]  %s60_s12, 8192, %s62_s16, [#allocation9], %s4651_s17, %s4651_s17, %s4652_s1  }
   0xb   :  { %s85_s3 = sshll.u32 %s5319_s5, 4  ;;  %s4653_s20 = smov [#allocation11]   ;;  %s86_s3 = int_to_ptr.hbm [resolvable:$true] %s85_s3 }
   0xc   :  { %s87_s21 = sshll.u32 %s4653_s20, 4  ;;  %s22_s24 = sshll.u32 %s5314_s0, 4  ;;  %s88_s21 = int_to_ptr.vmem [resolvable:$true] %s87_s21  ;;  %s23_s24 = int_to_ptr.hbm [resolvable:$true] %s22_s24 }
   0xd   :  { %93 = dma.hbm_to_vmem [thread:$0]  %s86_s3, 1024, %s88_s21, [#allocation12], %s4651_s17, %s4651_s17, %s4652_s1  }
   0xe   :  { %s4654_s25 = smov [#allocation2]   ;;  %s49_s29 = sshll.u32 %s5316_s2, 4  ;;  %s50_s29 = int_to_ptr.hbm [resolvable:$true] %s49_s29 }
   0xf   :  { %s24_s26 = sshll.u32 %s4654_s25, 4  ;;  %s72_s0 = sshll.u32 %s5318_s4, 4  ;;  %s25_s26 = int_to_ptr.vmem [resolvable:$true] %s24_s26  ;;  %s73_s0 = int_to_ptr.hbm [resolvable:$true] %s72_s0 }
  0x10   :  { %30 = dma.hbm_to_vmem [thread:$0]  %s23_s24, 256, %s25_s26, [#allocation3], %s4648_s13, %s4648_s13, %s4649_s14  }
  0x11   :  { %s4655_s9 = smov [#allocation7]   ;;  %s4656_s11 = smov [#allocation10]  }
  0x12   :  { %s51_s10 = sshll.u32 %s4655_s9, 4  ;;  %s74_s12 = sshll.u32 %s4656_s11, 4  ;;  %s52_s10 = int_to_ptr.vmem [resolvable:$true] %s51_s10  ;;  %s75_s12 = int_to_ptr.vmem [resolvable:$true] %s74_s12 }
  0x13   :  { %54 = dma.hbm_to_vmem [thread:$0]  %s50_s29, 128, %s52_s10, [#allocation6]  }
  0x14   :  { %s100_s2 = sshll.u32 %s5321_s7, 4  ;;  %s4657_s18 = smov [#allocation13]   ;;  %s101_s2 = int_to_ptr.hbm [resolvable:$true] %s100_s2 }
  0x15   :  { %80 = dma.hbm_to_vmem [thread:$0]  %s73_s0, 256, %s75_s12, [#allocation9], %s4648_s13, %s4648_s13, %s4649_s14  }
  0x16   :  { %s102_s19 = sshll.u32 %s4657_s18, 4  ;;  %s103_s19 = int_to_ptr.vmem [resolvable:$true] %s102_s19 }
  0x17   :  { %108 = dma.hbm_to_vmem [thread:$0]  %s101_s2, 1024, %s103_s19, [#allocation12], %s4651_s17, %s4651_s17, %s4652_s1  }
  0x18   :  { %4637 = dma.done.wait [#allocation3], 256  }
  0x19   :  { %4638 = vsyncadd [#allocation3], 4294967040 }
  0x1a   :  { %4639 = dma.done.wait [#allocation6], 384  }
  0x1b   :  { %4640 = vsyncadd [#allocation6], 4294966912 }
  0x1c   :  { %4641 = dma.done.wait [#allocation9], 8448  }
  0x1d   :  { %4642 = vsyncadd [#allocation9], 4294958848 }
  0x1e   :  { %4643 = dma.done.wait [#allocation12], 2048  }
  0x1f   :  { %4644 = vsyncadd [#allocation12], 4294965248  ;;  %v4066_v0 = vld [vmem:[#allocation8 + $0x78] sm:$0xff]  ;;  %v4065_v1 = vld [vmem:[#allocation8 + $0x70] sm:$0xff]  ;;  %s4658_s4 = smov 32   ;;  %s4659_s7 = smov 96  }
  0x20   :  { %333 = vmatpush.bf16.msra.mxu1 %v4066_v0  ;;  %v4058_v2 = vld [vmem:[#allocation8 + $0x38] sm:$0xff]  ;;  %v4057_v3 = vld [vmem:[#allocation8 + $0x30] sm:$0xff]  ;;  %v4064_v4 = vld [vmem:[#allocation8 + $0x68] sm:$0xff]  ;;  %vm507_vm0 = vcmask 261120   ;;  %vm572_vm1 = vcmask 64512   ;;  %vm926_vm2 = vcmask 1047556  }
  0x21   :  { %268 = vmatpush.bf16.msra.mxu0 %v4058_v2  ;;  %v4056_v5 = vld [vmem:[#allocation8 + $0x28] sm:$0xff]  ;;  %v4063_v6 = vld [vmem:[#allocation8 + $0x60] sm:$0xff]  ;;  %v4062_v8 = vld [vmem:[#allocation8 + $0x58] sm:$0xff]  ;;  %vm1049_vm3 = vcmask 523264   ;;  %vm1051_vm4 = vcmask 785408   ;;  %s3666_s22 = sshll.u32 %s5322_s8, 4  ;;  %s3667_s22 = int_to_ptr.hbm [resolvable:$true] %s3666_s22 }
  0x22   :  { %v4055_v7 = vld [vmem:[#allocation8 + $0x20] sm:$0xff]  ;;  %v4054_v9 = vld [vmem:[#allocation8 + $0x18] sm:$0xff]  ;;  %v4061_v10 = vld [vmem:[#allocation8 + $0x50] sm:$0xff] }
  0x23   :  { %v4053_v11 = vld [vmem:[#allocation8 + $0x10] sm:$0xff]  ;;  %v4060_v12 = vld [vmem:[#allocation8 + $0x48] sm:$0xff]  ;;  %v4059_v14 = vld [vmem:[#allocation8 + $0x40] sm:$0xff] }
  0x24   :  { %334 = vmatpush.bf16.msra.mxu1 %v4065_v1  ;;  %v4052_v13 = vld [vmem:[#allocation8 + $0x8] sm:$0xff]  ;;  %v138_v15 = vld [vmem:[#allocation2] sm:$0xff]  ;;  %v139_v16 = vld [vmem:[#allocation2 + $0x8] sm:$0xff] }
  0x25   :  { %269 = vmatpush.bf16.msra.mxu0 %v4057_v3  ;;  %v218_v17 = vpack.c.bf16 %v139_v16, %v138_v15  ;;  %v4051_v18 = vld [vmem:[#allocation8] sm:$0xff]  ;;  %v4074_v19 = vld [vmem:[#allocation8 + $0xb8] sm:$0xff]  ;;  %v4073_v20 = vld [vmem:[#allocation8 + $0xb0] sm:$0xff] }
  0x26   :  { %396 = vmatpush.bf16.msra.mxu2 %v4074_v19  ;;  %v4748_v21 = vld [vmem:[#allocation10] sm:$0xff]  ;;  %v4072_v22 = vld [vmem:[#allocation8 + $0xa8] sm:$0xff]  ;;  %v4070_v30 = vld [vmem:[#allocation8 + $0x98] sm:$0xff] }
  0x27   :  { %v284_v23 = vperm.slane %v4748_v21, 1  ;;  %v4071_v24 = vld [vmem:[#allocation8 + $0xa0] sm:$0xff]  ;;  %v219_v26 = vperm.slane %v4748_v21, 0  ;;  %v4069_v33 = vld [vmem:[#allocation8 + $0x90] sm:$0xff]  ;;  %v4068_v35 = vld [vmem:[#allocation8 + $0x88] sm:$0xff]  ;;  %v347_v43 = vperm.slane %v4748_v21, 2 }
  0x28   :  { %335 = vmatpush.bf16.msra.mxu1 %v4064_v4  ;;  %v4067_v38 = vld [vmem:[#allocation8 + $0x80] sm:$0xff]  ;;  %v4785_v59 = vld [vmem:[#allocation7] sm:$0xff] }
  0x29   :  { %270 = vmatpush.bf16.msra.mxu0 %v4056_v5 }
  0x2a   :  { %397 = vmatpush.bf16.msra.mxu2 %v4073_v20 }
  0x2c   :  { %336 = vmatpush.bf16.msra.mxu1 %v4063_v6 }
  0x2d   :  { %271 = vmatpush.bf16.msra.mxu0 %v4055_v7 }
  0x2e   :  { %398 = vmatpush.bf16.msra.mxu2 %v4072_v22 }
  0x30   :  { %337 = vmatpush.bf16.msra.mxu1 %v4062_v8 }
  0x31   :  { %272 = vmatpush.bf16.msra.mxu0 %v4054_v9 }
  0x32   :  { %399 = vmatpush.bf16.msra.mxu2 %v4071_v24 }
  0x34   :  { %338 = vmatpush.bf16.msra.mxu1 %v4061_v10 }
  0x35   :  { %273 = vmatpush.bf16.msra.mxu0 %v4053_v11 }
  0x36   :  { %400 = vmatpush.bf16.msra.mxu2 %v4070_v30 }
  0x38   :  { %339 = vmatpush.bf16.msra.mxu1 %v4060_v12 }
  0x39   :  { %274 = vmatpush.bf16.msra.mxu0 %v4052_v13 }
  0x3a   :  { %401 = vmatpush.bf16.msra.mxu2 %v4069_v33 }
  0x3c   :  { %340 = vmatpush.bf16.msra.mxu1 %v4059_v14 }
  0x3d   :  { %275 = vmatpush.bf16.msra.mxu0 %v4051_v18 }
  0x3e   :  { %402 = vmatpush.bf16.msra.mxu2 %v4068_v35 }
  0x3f   :  { %341 = vmatmul.bf16.vlgmr.msra.gmra.mxu1 %v218_v17 }
  0x40   :  { %276 = vmatmul.bf16.vlgmr.msra.gmra.mxu0 %v218_v17 }
  0x42   :  { %403 = vmatpush.bf16.msra.mxu2 %v4067_v38 }
  0x45   :  { %404 = vmatmul.bf16.vlgmr.msra.gmra.mxu2 %v218_v17 }
  0xbc   :  { %v342_v25 = vpop.f32.mrf.mxu1 }
  0xbd   :  { %v343_v27 = vadd.f32 %v342_v25, %v284_v23  ;;  %v277_v29 = vpop.f32.mrf.mxu0 }
  0xbe   :  { %v278_v31 = vadd.f32 %v277_v29, %v219_v26 }
  0xbf   :  { %v412_v28 = vpack.c.bf16 %v343_v27, %v343_v27 }
  0xc0   :  { %v282_v32 = vmul.f32 0.35355338, %v278_v31 }
  0xc1   :  { %430 = vrot.lane.b32.xlu2 %v412_v28, %s4658_s4  ;;  %424 = vrot.lane.b32.xlu0 %v412_v28, %s4659_s7 }
  0xc2   :  { %v410_v34 = vpack.c.bf16 %v282_v32, %v282_v32 }
  0xc4   :  { %417 = vrot.lane.b32.xlu1 %v410_v34, %s4659_s7  ;;  %v344_v36 = vpop.f32.mrf.mxu1 }
  0xc5   :  { %v345_v37 = vadd.f32 %v344_v36, %v284_v23  ;;  %v279_v62 = vpop.f32.mrf.mxu0 }
  0xc6   :  { %v280_v33 = vadd.f32 %v279_v62, %v219_v26 }
  0xc7   :  { %v4759_v39 = vpack.c.bf16 %v345_v37, %v345_v37 }
  0xc8   :  { %v405_v44 = vpop.f32.mrf.mxu2 }
  0xc9   :  { %427 = vrot.lane.b32.xlu0 %v412_v28, %s4651_s17  ;;  %419 = vrot.lane.b32.xlu2 %v410_v34, %s4651_s17  ;;  %v406_v45 = vadd.f32 %v405_v44, %v347_v43 }
  0xcb   :  { %v4767_v46 = vpack.c.bf16 %v406_v45, %v406_v45 }
  0xd1   :  { %1061 = vrot.lane.b32.xlu0 %v4759_v39, %s4659_s7  ;;  %421 = vrot.lane.b32.xlu2 %v410_v34, %s4658_s4 }
  0xd9   :  { %437 = vrot.lane.b32.xlu2 %v4767_v46, %s4651_s17 }
  0xe1   :  { %440 = vrot.lane.b32.xlu2 %v4767_v46, %s4658_s4 }
 0x11b   :  { %v431_v41 = vpop.permute.xlu2 %430 }
 0x123   :  { %v420_v56 = vpop.permute.xlu2 %419 }
 0x12b   :  { %v422_v58 = vpop.permute.xlu2 %421 }
 0x133   :  { %v425_v40 = vpop.permute.xlu0 %424  ;;  %v438_v14 = vpop.permute.xlu2 %437 }
 0x134   :  { %4149 = vxpose.binary.xlu1.c.b16.start.end [1/2] (short) (narrow) %v425_v40, %v412_v28, 32 }
 0x136   :  { %v418_v47 = vpop.permute.xlu1 %417 }
 0x13b   :  { %v428_v42 = vpop.permute.xlu0 %427  ;;  %v441_v15 = vpop.permute.xlu2 %440 }
 0x13c   :  { %4154 = vxpose.binary.xlu0.c.b16.start.end [1/2] (short) (narrow) %v431_v41, %v428_v42, 32 }
 0x143   :  { %v4779_v48 = vpop.permute.xlu0 %1061 }
 0x19e   :  { %434 = vrot.lane.b32.xlu1 %v4767_v46, %s4659_s7 }
 0x1a6   :  { %1064 = vrot.lane.b32.xlu1 %v4759_v39, %s4651_s17 }
 0x1ae   :  { %1067 = vrot.lane.b32.xlu1 %v4759_v39, %s4658_s4 }
 0x1e0   :  { %v4150_v49 = vpop.trf.xlu1 }
 0x1e8   :  { %v4155_v50 = vpop.trf.xlu0  ;;  %v4151_v51 = vpop.trf.xlu1 }
 0x1f0   :  { %v4156_v52 = vpop.trf.xlu0  ;;  %v4152_v53 = vpop.trf.xlu1 }
 0x1f1   :  { %517 = vmatpush.bf16.msra.mxu3 %v4152_v53 }
 0x1f5   :  { %518 = vmatpush.bf16.msra.mxu3 %v4150_v49 }
 0x1f8   :  { %v4157_v54 = vpop.trf.xlu0  ;;  %3779 = vmatmul.msk.bf16.vlgmr.msra.gmra.mxu3 %vm507_vm0, %v410_v34  ;;  %v4153_v55 = vpop.trf.xlu1  ;;  %v283_v34 = vmul.f32 0.35355338, %v280_v33 }
 0x1f9   :  { %533 = vmatpush.bf16.msrb.mxu3 %v4153_v55 }
 0x1fa   :  { %v4800_v35 = vpack.c.bf16 %v283_v34, %v283_v34 }
 0x1fd   :  { %534 = vmatpush.bf16.msrb.mxu3 %v4151_v51 }
 0x200   :  { %v4158_v57 = vpop.trf.xlu0 }
 0x201   :  { %549 = vmatpush.bf16.msra.mxu3 %v4157_v54  ;;  %565 = vmatpush.bf16.msrb.mxu0 %v4158_v57 }
 0x205   :  { %550 = vmatpush.bf16.msra.mxu3 %v4155_v50  ;;  %566 = vmatpush.bf16.msrb.mxu0 %v4156_v52 }
 0x208   :  { %3780 = vmatmul.msk.bf16.vlgmr.msrb.gmra.mxu3 %vm507_vm0, %v418_v47  ;;  %3782 = vmatmul.msk.bf16.vlgmr.msrb.gmra.mxu0 %vm507_vm0, %v422_v58 }
 0x210   :  { %v435_v13 = vpop.permute.xlu1 %434 }
 0x218   :  { %3781 = vmatmul.msk.bf16.vlgmr.msra.gmra.mxu3 %vm507_vm0, %v420_v56  ;;  %v1065_v26 = vpop.permute.xlu1 %1064 }
 0x220   :  { %v1068_v42 = vpop.permute.xlu1 %1067 }
 0x27b   :  { %v520_v60 = vpop.f32.mrf.mxu3 }
 0x27c   :  { %v521_v61 = vadd.f32 %v520_v60, %v4785_v59 }
 0x27e   :  { %v573_v63 = vsel %vm572_vm1, %v521_v61, -inf }
 0x27f   :  { %574 = vmax.xlane.f32.xlu2 %v573_v63 }
 0x283   :  { %v522_v0 = vpop.f32.mrf.mxu3 }
 0x285   :  { %v568_v1 = vpop.f32.mrf.mxu0 }
 0x286   :  { %v569_v2 = vadd.f32 %v568_v1, %v4785_v59 }
 0x288   :  { %v582_v3 = vsel %vm572_vm1, %v569_v2, -inf }
 0x289   :  { %583 = vmax.xlane.f32.xlu2 %v582_v3 }
 0x28b   :  { %v536_v4 = vpop.f32.mrf.mxu3 }
 0x28c   :  { %v537_v5 = vadd.f32 %v536_v4, %v4785_v59 }
 0x28d   :  { %v570_v6 = vpop.f32.mrf.mxu0 }
 0x28e   :  { %v576_v7 = vsel %vm572_vm1, %v537_v5, -inf }
 0x28f   :  { %577 = vmax.xlane.f32.xlu0 %v576_v7 }
 0x293   :  { %v538_v8 = vpop.f32.mrf.mxu3 }
 0x29b   :  { %v552_v9 = vpop.f32.mrf.mxu3 }
 0x29c   :  { %v553_v10 = vadd.f32 %v552_v9, %v4785_v59 }
 0x29e   :  { %v579_v11 = vsel %vm572_vm1, %v553_v10, -inf }
 0x29f   :  { %580 = vmax.xlane.f32.xlu2 %v579_v11 }
 0x2a3   :  { %v554_v12 = vpop.f32.mrf.mxu3 }
 0x2b8   :  { %4159 = vxpose.binary.xlu0.c.b16.start.end [1/2] (short) (narrow) %v435_v13, %v438_v14, 32 }
 0x2f2   :  { %v575_v16 = vpop.xlane.xlu2 %574 }
 0x2f3   :  { %v585_v17 = vsub.f32 %v521_v61, %v575_v16 }
 0x2f5   :  { %v589_v18 = vmul.f32 1.442695, %v585_v17 }
 0x2f7   :  { %4364 = vpow2.f32 %v589_v18 }
 0x2fc   :  { %v584_v19 = vpop.xlane.xlu2 %583 }
 0x2fd   :  { %v4365_v20 = vpop.eup %4364  ;;  %v588_v22 = vsub.f32 %v569_v2, %v584_v19 }
 0x2fe   :  { %v597_v23 = vsel %vm572_vm1, %v4365_v20, 0.0 }
 0x2ff   :  { %v595_v24 = vmul.f32 1.442695, %v588_v22  ;;  %598 = vadd.xlane.f32.xlu1 %v597_v23 }
 0x301   :  { %4366 = vpow2.f32 %v595_v24 }
 0x302   :  { %v578_v25 = vpop.xlane.xlu0 %577 }
 0x303   :  { %v586_v27 = vsub.f32 %v537_v5, %v578_v25  ;;  %v407_v25 = vpop.f32.mrf.mxu2 }
 0x305   :  { %v591_v28 = vmul.f32 1.442695, %v586_v27 }
 0x307   :  { %v4367_v29 = vpop.eup %4366  ;;  %4368 = vpow2.f32 %v591_v28 }
 0x308   :  { %v606_v30 = vsel %vm572_vm1, %v4367_v29, 0.0 }
 0x309   :  { %607 = vadd.xlane.f32.xlu2 %v606_v30 }
 0x30d   :  { %v4369_v31 = vpop.eup %4368 }
 0x30e   :  { %v600_v32 = vsel %vm572_vm1, %v4369_v31, 0.0 }
 0x30f   :  { %601 = vadd.xlane.f32.xlu1 %v600_v32 }
 0x312   :  { %v581_v36 = vpop.xlane.xlu2 %580 }
 0x313   :  { %v587_v37 = vsub.f32 %v553_v10, %v581_v36 }
 0x315   :  { %v593_v38 = vmul.f32 1.442695, %v587_v37 }
 0x317   :  { %4370 = vpow2.f32 %v593_v38 }
 0x31d   :  { %v4371_v40 = vpop.eup %4370 }
 0x31e   :  { %v603_v41 = vsel %vm572_vm1, %v4371_v40, 0.0 }
 0x321   :  { %1056 = vrot.lane.b32.xlu2 %v4800_v35, %s4651_s17 }
 0x336   :  { %1054 = vrot.lane.b32.xlu0 %v4800_v35, %s4659_s7 }
 0x349   :  { %4164 = vxpose.binary.xlu1.c.b16.start.end [1/2] (short) (narrow) %v441_v15, %v4767_v46, 32 }
 0x34a   :  { %604 = vadd.xlane.f32.xlu2 %v603_v41 }
 0x364   :  { %v4160_v55 = vpop.trf.xlu0 }
 0x36c   :  { %v4161_v61 = vpop.trf.xlu0 }
 0x372   :  { %v599_v44 = vpop.xlane.xlu1 %598 }
 0x373   :  { %4372 = vrcp.f32 %v599_v44  ;;  %4169 = vxpose.binary.xlu2.c.b16.start.end [1/2] (short) (narrow) %v4779_v48, %v1065_v26, 32 }
 0x374   :  { %v4162_v62 = vpop.trf.xlu0 }
 0x379   :  { %v4373_v45 = vpop.eup %4372 }
 0x37a   :  { %v613_v47 = vmul.f32 %v4373_v45, %v4365_v20 }
 0x37c   :  { %v608_v49 = vpop.xlane.xlu2 %607  ;;  %v617_v50 = vpack.c.bf16 %v613_v47, %v613_v47  ;;  %v4163_v63 = vpop.trf.xlu0 }
 0x37d   :  { %4374 = vrcp.f32 %v608_v49 }
 0x37e   :  { %v692_v51 = vsel %vm572_vm1, %v617_v50, 0  ;;  %v408_v50 = vadd.f32 %v407_v25, %v347_v43 }
 0x37f   :  { %701 = vmatpush.bf16.xpose.msrb.mxu1 %v692_v51 }
 0x380   :  { %v415_v51 = vpack.c.bf16 %v408_v50, %v408_v50 }
 0x382   :  { %v602_v52 = vpop.xlane.xlu1 %601 }
 0x383   :  { %v4375_v53 = vpop.eup %4374  ;;  %4376 = vrcp.f32 %v602_v52 }
 0x384   :  { %v616_v46 = vmul.f32 %v4375_v53, %v4367_v29  ;;  %v1057_v0 = vpop.permute.xlu2 %1056 }
 0x386   :  { %v620_v54 = vpack.c.bf16 %v616_v46, %v616_v46 }
 0x388   :  { %v776_v56 = vsel %vm572_vm1, %v620_v54, 0 }
 0x389   :  { %v4377_v57 = vpop.eup %4376  ;;  %785 = vmatpush.bf16.xpose.msra.mxu0 %v776_v56 }
 0x38a   :  { %v614_v58 = vmul.f32 %v4377_v57, %v4369_v31 }
 0x38c   :  { %v618_v48 = vpack.c.bf16 %v614_v58, %v614_v58 }
 0x38e   :  { %v720_v60 = vsel %vm572_vm1, %v618_v48, 0 }
 0x38f   :  { %729 = vmatpush.bf16.xpose.msrb.mxu2 %v720_v60 }
 0x393   :  { %4174 = vxpose.binary.xlu2.c.b16.start.end [1/2] (short) (narrow) %v1068_v42, %v4759_v39, 32 }
 0x396   :  { %3785 = vmatmul.msk.bf16.vlgmr.msrb.gmra.mxu2 %vm572_vm1, %v4161_v61 }
 0x3a6   :  { %3786 = vmatmul.msk.bf16.gmra.mxu2 %vm572_vm1, %v4163_v63 }
 0x3a8   :  { %v1055_v13 = vpop.permute.xlu0 %1054 }
 0x3b3   :  { %1058 = vrot.lane.b32.xlu1 %v4800_v35, %s4658_s4 }
 0x3bd   :  { %v605_v1 = vpop.xlane.xlu2 %604 }
 0x3be   :  { %4378 = vrcp.f32 %v605_v1 }
 0x3c4   :  { %v4379_v2 = vpop.eup %4378 }
 0x3c5   :  { %v615_v3 = vmul.f32 %v4379_v2, %v4371_v40 }
 0x3c7   :  { %v619_v4 = vpack.c.bf16 %v615_v3, %v615_v3 }
 0x3c9   :  { %v748_v5 = vsel %vm572_vm1, %v619_v4, 0 }
 0x3ca   :  { %757 = vmatpush.bf16.xpose.msrb.mxu3 %v748_v5 }
 0x3d1   :  { %3787 = vmatmul.msk.bf16.vlgmr.msrb.gmra.mxu3 %vm572_vm1, %v4160_v55 }
 0x3e1   :  { %3788 = vmatmul.msk.bf16.gmra.mxu3 %vm572_vm1, %v4162_v62 }
 0x3f5   :  { %v4165_v39 = vpop.trf.xlu1 }
 0x3f6   :  { %3783 = vmatmul.msk.bf16.vlgmr.msrb.gmra.mxu1 %vm572_vm1, %v4165_v39 }
 0x3fd   :  { %v4166_v6 = vpop.trf.xlu1 }
 0x3fe   :  { %3789 = vmatmul.msk.bf16.vlgmr.msra.gmra.mxu0 %vm572_vm1, %v4166_v6 }
 0x405   :  { %v4167_v7 = vpop.trf.xlu1 }
 0x406   :  { %3784 = vmatmul.msk.bf16.gmra.mxu1 %vm572_vm1, %v4167_v7 }
 0x40d   :  { %v4168_v8 = vpop.trf.xlu1 }
 0x40e   :  { %3790 = vmatmul.msk.bf16.gmra.mxu0 %vm572_vm1, %v4168_v8 }
 0x414   :  { %v4170_v9 = vpop.trf.xlu2 }
 0x419   :  { %v4841_v28 = vpop.f32.mrf.mxu2 }
 0x41c   :  { %v4171_v10 = vpop.trf.xlu2 }
 0x424   :  { %v4172_v11 = vpop.trf.xlu2 }
 0x425   :  { %1185 = vmatpush.bf16.msra.mxu3 %v4172_v11  ;;  %v1059_v18 = vpop.permute.xlu1 %1058 }
 0x429   :  { %1186 = vmatpush.bf16.msra.mxu3 %v4170_v9 }
 0x42c   :  { %3793 = vmatmul.msk.bf16.vlgmr.msra.gmra.mxu3 %vm507_vm0, %v1057_v0  ;;  %v4173_v12 = vpop.trf.xlu2 }
 0x42d   :  { %1169 = vmatpush.bf16.msra.mxu2 %v4173_v12 }
 0x431   :  { %1170 = vmatpush.bf16.msra.mxu2 %v4171_v10 }
 0x434   :  { %v4175_v14 = vpop.trf.xlu2  ;;  %3792 = vmatmul.msk.bf16.vlgmr.msra.gmra.mxu2 %vm507_vm0, %v1055_v13 }
 0x43c   :  { %v4176_v15 = vpop.trf.xlu2 }
 0x444   :  { %v4177_v16 = vpop.trf.xlu2 }
 0x445   :  { %1153 = vmatpush.bf16.msra.mxu1 %v4177_v16 }
 0x449   :  { %1154 = vmatpush.bf16.msra.mxu1 %v4175_v14 }
 0x44c   :  { %v4178_v17 = vpop.trf.xlu2  ;;  %3791 = vmatmul.msk.bf16.vlgmr.msra.gmra.mxu1 %vm507_vm0, %v4800_v35  ;;  %v4855_v35 = vpop.f32.mrf.mxu2 }
 0x44d   :  { %1201 = vmatpush.bf16.msrb.mxu0 %v4178_v17 }
 0x451   :  { %1202 = vmatpush.bf16.msrb.mxu0 %v4176_v15 }
 0x454   :  { %3794 = vmatmul.msk.bf16.vlgmr.msrb.gmra.mxu0 %vm507_vm0, %v1059_v18  ;;  %v4839_v27 = vpop.f32.mrf.mxu3  ;;  %v4861_v38 = vpop.f32.mrf.mxu2 }
 0x45c   :  { %v4847_v31 = vpop.f32.mrf.mxu3  ;;  %v4865_v41 = vpop.f32.mrf.mxu2 }
 0x464   :  { %v4859_v37 = vpop.f32.mrf.mxu3 }
 0x46c   :  { %v4863_v40 = vpop.f32.mrf.mxu3 }
 0x473   :  { %v4829_v19 = vpop.f32.mrf.mxu1 }
 0x47b   :  { %v4831_v20 = vpop.f32.mrf.mxu0  ;;  %v4835_v23 = vpop.f32.mrf.mxu1 }
 0x47c   :  { %v4189_v22 = vpack.i.bf16 %v4831_v20, %v4829_v19 }
 0x483   :  { %v4837_v24 = vpop.f32.mrf.mxu0  ;;  %v4843_v29 = vpop.f32.mrf.mxu1 }
 0x484   :  { %v4191_v14 = vpack.i.bf16 %v4837_v24, %v4835_v23 }
 0x48b   :  { %v4845_v30 = vpop.f32.mrf.mxu0  ;;  %v4851_v33 = vpop.f32.mrf.mxu1 }
 0x48c   :  { %v4193_v32 = vpack.i.bf16 %v4845_v30, %v4843_v29 }
 0x493   :  { %v4853_v34 = vpop.f32.mrf.mxu0 }
 0x494   :  { %v4195_v36 = vpack.i.bf16 %v4853_v34, %v4851_v33 }
 0x4af   :  { %v1188_v26 = vpop.f32.mrf.mxu3 }
 0x4b0   :  { %v1189_v42 = vadd.f32 %v1188_v26, %v4785_v59 }
 0x4b2   :  { %v1214_v44 = vsel %vm572_vm1, %v1189_v42, -inf }
 0x4b3   :  { %1215 = vmax.xlane.f32.xlu2 %v1214_v44 }
 0x4b7   :  { %v1172_v45 = vpop.f32.mrf.mxu2  ;;  %v1190_v47 = vpop.f32.mrf.mxu3 }
 0x4b8   :  { %v1173_v58 = vadd.f32 %v1172_v45, %v4785_v59 }
 0x4ba   :  { %v1211_v43 = vsel %vm572_vm1, %v1173_v58, -inf }
 0x4bf   :  { %v1174_v49 = vpop.f32.mrf.mxu2 }
 0x4c9   :  { %v1156_v52 = vpop.f32.mrf.mxu1 }
 0x4ca   :  { %v1157_v53 = vadd.f32 %v1156_v52, %v4785_v59 }
 0x4cb   :  { %1077 = vrot.lane.b32.xlu2 %v415_v51, %s4658_s4 }
 0x4cc   :  { %v1208_v46 = vsel %vm572_vm1, %v1157_v53, -inf }
 0x4cd   :  { %1209 = vmax.xlane.f32.xlu1 %v1208_v46 }
 0x4d1   :  { %v1158_v54 = vpop.f32.mrf.mxu1  ;;  %v1204_v55 = vpop.f32.mrf.mxu0 }
 0x4d2   :  { %v1205_v56 = vadd.f32 %v1204_v55, %v4785_v59 }
 0x4d4   :  { %v1217_v57 = vsel %vm572_vm1, %v1205_v56, -inf }
 0x4d5   :  { %1218 = vmax.xlane.f32.xlu0 %v1217_v57 }
 0x4d9   :  { %v1206_v21 = vpop.f32.mrf.mxu0 }
 0x4dd   :  { %1212 = vmax.xlane.f32.xlu0 %v1211_v43 }
 0x4e6   :  { %1074 = vrot.lane.b32.xlu1 %v415_v51, %s4651_s17 }
 0x4f1   :  { %1071 = vrot.lane.b32.xlu0 %v415_v51, %s4659_s7 }
 0x526   :  { %v1216_v48 = vpop.xlane.xlu2 %1215 }
 0x527   :  { %v1222_v60 = vsub.f32 %v1189_v42, %v1216_v48 }
 0x529   :  { %v1228_v61 = vmul.f32 1.442695, %v1222_v60 }
 0x52b   :  { %4380 = vpow2.f32 %v1228_v61 }
 0x52e   :  { %v1078_v13 = vpop.permute.xlu2 %1077 }
 0x531   :  { %v4381_v62 = vpop.eup %4380 }
 0x532   :  { %v1238_v63 = vsel %vm572_vm1, %v4381_v62, 0.0 }
 0x533   :  { %1239 = vadd.xlane.f32.xlu0 %v1238_v63 }
 0x540   :  { %v1210_v0 = vpop.xlane.xlu1 %1209 }
 0x541   :  { %v1220_v1 = vsub.f32 %v1157_v53, %v1210_v0 }
 0x543   :  { %v1224_v2 = vmul.f32 1.442695, %v1220_v1 }
 0x545   :  { %4382 = vpow2.f32 %v1224_v2 }
 0x548   :  { %v1219_v59 = vpop.xlane.xlu0 %1218 }
 0x549   :  { %v1223_v3 = vsub.f32 %v1205_v56, %v1219_v59 }
 0x54b   :  { %v4383_v4 = vpop.eup %4382  ;;  %v1230_v5 = vmul.f32 1.442695, %v1223_v3 }
 0x54c   :  { %v1232_v39 = vsel %vm572_vm1, %v4383_v4, 0.0 }
 0x54d   :  { %4384 = vpow2.f32 %v1230_v5  ;;  %1233 = vadd.xlane.f32.xlu0 %v1232_v39 }
 0x550   :  { %v1213_v6 = vpop.xlane.xlu0 %1212 }
 0x551   :  { %v1221_v7 = vsub.f32 %v1173_v58, %v1213_v6 }
 0x553   :  { %v4385_v8 = vpop.eup %4384  ;;  %v1226_v9 = vmul.f32 1.442695, %v1221_v7 }
 0x554   :  { %v1241_v10 = vsel %vm572_vm1, %v4385_v8, 0.0 }
 0x555   :  { %4386 = vpow2.f32 %v1226_v9  ;;  %1242 = vadd.xlane.f32.xlu2 %v1241_v10 }
 0x558   :  { %v1075_v15 = vpop.permute.xlu1 %1074 }
 0x55b   :  { %v4387_v11 = vpop.eup %4386 }
 0x55c   :  { %v1235_v12 = vsel %vm572_vm1, %v4387_v11, 0.0 }
 0x55d   :  { %1236 = vadd.xlane.f32.xlu1 %v1235_v12 }
 0x563   :  { %v1072_v16 = vpop.permute.xlu0 %1071 }
 0x576   :  { %4184 = vxpose.binary.xlu0.c.b16.start.end [1/2] (short) (narrow) %v1078_v13, %v415_v51, 32 }
 0x58d   :  { %4190 = vxpose.xlu0.b32.start [1/4] (short) (narrow) %v4189_v22, 8 }
 0x595   :  { %4192 = vxpose.xlu0.b32.cont [2/4] (short) (narrow) %v4191_v14, 8 }
 0x597   :  { %4179 = vxpose.binary.xlu1.c.b16.start.end [1/2] (short) (narrow) %v1072_v16, %v1075_v15, 32 }
 0x59d   :  { %4194 = vxpose.xlu0.b32.cont [3/4] (short) (narrow) %v4193_v32, 8 }
 0x5a5   :  { %4196 = vxpose.xlu0.b32.end [4/4] (short) (narrow) %v4195_v36, 8 }
 0x5a6   :  { %v1240_v17 = vpop.xlane.xlu0 %1239 }
 0x5a7   :  { %4388 = vrcp.f32 %v1240_v17 }
 0x5ad   :  { %v4389_v18 = vpop.eup %4388 }
 0x5ae   :  { %v1250_v19 = vmul.f32 %v4389_v18, %v4381_v62 }
 0x5b0   :  { %v1254_v20 = vpack.c.bf16 %v1250_v19, %v1250_v19 }
 0x5b2   :  { %v1383_v22 = vsel %vm572_vm1, %v1254_v20, 0 }
 0x5b3   :  { %1392 = vmatpush.bf16.xpose.msrb.mxu3 %v1383_v22 }
 0x5c0   :  { %v1234_v23 = vpop.xlane.xlu0 %1233 }
 0x5c1   :  { %4390 = vrcp.f32 %v1234_v23 }
 0x5c7   :  { %v4391_v24 = vpop.eup %4390 }
 0x5c8   :  { %v1243_v25 = vpop.xlane.xlu2 %1242  ;;  %v1248_v26 = vmul.f32 %v4391_v24, %v4383_v4 }
 0x5c9   :  { %4392 = vrcp.f32 %v1243_v25 }
 0x5ca   :  { %v1252_v29 = vpack.c.bf16 %v1248_v26, %v1248_v26 }
 0x5cc   :  { %v1327_v30 = vsel %vm572_vm1, %v1252_v29, 0 }
 0x5cd   :  { %1336 = vmatpush.bf16.xpose.msrb.mxu1 %v1327_v30 }
 0x5cf   :  { %v4393_v32 = vpop.eup %4392 }
 0x5d0   :  { %v1237_v33 = vpop.xlane.xlu1 %1236  ;;  %v1251_v34 = vmul.f32 %v4393_v32, %v4385_v8 }
 0x5d1   :  { %4394 = vrcp.f32 %v1237_v33  ;;  %v4661_v33 = vmov 1934713408  }
 0x5d2   :  { %v1255_v36 = vpack.c.bf16 %v1251_v34, %v1251_v34  ;;  %v955_v34 = vunpack.c.l.s4 %v4661_v33 }
 0x5d4   :  { %v1411_v42 = vsel %vm572_vm1, %v1255_v36, 0 }
 0x5d5   :  { %1420 = vmatpush.bf16.xpose.msra.mxu0 %v1411_v42 }
 0x5d7   :  { %v4395_v44 = vpop.eup %4394 }
 0x5d8   :  { %v1249_v45 = vmul.f32 %v4395_v44, %v4387_v11 }
 0x5da   :  { %v1253_v47 = vpack.c.bf16 %v1249_v45, %v1249_v45 }
 0x5dc   :  { %v1355_v49 = vsel %vm572_vm1, %v1253_v47, 0 }
 0x5dd   :  { %1364 = vmatpush.bf16.xpose.msrb.mxu2 %v1355_v49 }
 0x622   :  { %v4185_v50 = vpop.trf.xlu0 }
 0x623   :  { %3795 = vmatmul.msk.bf16.vlgmr.msrb.gmra.mxu1 %vm572_vm1, %v4185_v50 }
 0x62a   :  { %v4186_v51 = vpop.trf.xlu0 }
 0x62b   :  { %3801 = vmatmul.msk.bf16.vlgmr.msra.gmra.mxu0 %vm572_vm1, %v4186_v51 }
 0x632   :  { %v4187_v52 = vpop.trf.xlu0 }
 0x633   :  { %3796 = vmatmul.msk.bf16.gmra.mxu1 %vm572_vm1, %v4187_v52 }
 0x63a   :  { %v4188_v46 = vpop.trf.xlu0 }
 0x63b   :  { %3802 = vmatmul.msk.bf16.gmra.mxu0 %vm572_vm1, %v4188_v46 }
 0x642   :  { %v4197_v10 = vpop.trf.xlu0 }
 0x643   :  { %v4180_v53 = vpop.trf.xlu1  ;;  %v4198_v25 = vunpack.i.l.bf16 %v4197_v10 }
 0x644   :  { %3799 = vmatmul.msk.bf16.vlgmr.msrb.gmra.mxu3 %vm572_vm1, %v4180_v53  ;;  %v4925_v53 = vunpack.c.0.s8 %v955_v34 }
 0x645   :  { %v928_v36 = vrot.slane %v4198_v25, 4 }
 0x64b   :  { %v4181_v54 = vpop.trf.xlu1 }
 0x64c   :  { %3797 = vmatmul.msk.bf16.vlgmr.msrb.gmra.mxu2 %vm572_vm1, %v4181_v54 }
 0x653   :  { %v4182_v55 = vpop.trf.xlu1 }
 0x654   :  { %3800 = vmatmul.msk.bf16.gmra.mxu3 %vm572_vm1, %v4182_v55 }
 0x65b   :  { %v4183_v56 = vpop.trf.xlu1 }
 0x65c   :  { %3798 = vmatmul.msk.bf16.gmra.mxu2 %vm572_vm1, %v4183_v56 }
 0x6a0   :  { %v1338_v57 = vpop.f32.mrf.mxu1 }
 0x6a8   :  { %v1422_v58 = vpop.f32.mrf.mxu0  ;;  %v1340_v43 = vpop.f32.mrf.mxu1 }
 0x6a9   :  { %v4202_v21 = vpack.i.bf16 %v1422_v58, %v1338_v57 }
 0x6ab   :  { %4203 = vxpose.xlu1.b32.start [1/4] (short) (narrow) %v4202_v21, 8 }
 0x6b0   :  { %v1424_v48 = vpop.f32.mrf.mxu0  ;;  %v1343_v61 = vpop.f32.mrf.mxu1 }
 0x6b1   :  { %v4204_v60 = vpack.i.bf16 %v1424_v48, %v1340_v43 }
 0x6b3   :  { %4205 = vxpose.xlu1.b32.cont [2/4] (short) (narrow) %v4204_v60, 8 }
 0x6b8   :  { %v1427_v62 = vpop.f32.mrf.mxu0  ;;  %v1345_v0 = vpop.f32.mrf.mxu1 }
 0x6b9   :  { %v4206_v63 = vpack.i.bf16 %v1427_v62, %v1343_v61 }
 0x6bb   :  { %4207 = vxpose.xlu1.b32.cont [3/4] (short) (narrow) %v4206_v63, 8 }
 0x6c0   :  { %v1429_v1 = vpop.f32.mrf.mxu0 }
 0x6c1   :  { %v4208_v2 = vpack.i.bf16 %v1429_v1, %v1345_v0 }
 0x6c3   :  { %4209 = vxpose.xlu1.b32.end [4/4] (short) (narrow) %v4208_v2, 8 }
 0x6c7   :  { %v1394_v7 = vpop.f32.mrf.mxu3 }
 0x6c8   :  { %v4228_v11 = vpack.i.bf16 %v1394_v7, %v4839_v27  ;;  %v4660_v27 = vmov 1983009808  }
 0x6c9   :  { %v931_v20 = vunpack.c.l.s4 %v4660_v27 }
 0x6cb   :  { %v4915_v26 = vunpack.c.0.s8 %v931_v20 }
 0x6cf   :  { %v1366_v59 = vpop.f32.mrf.mxu2  ;;  %v1396_v12 = vpop.f32.mrf.mxu3 }
 0x6d0   :  { %v4215_v3 = vpack.i.bf16 %v1366_v59, %v4841_v28  ;;  %v4230_v28 = vpack.i.bf16 %v1396_v12, %v4847_v31 }
 0x6d2   :  { %4216 = vxpose.xlu2.b32.start [1/4] (short) (narrow) %v4215_v3, 8 }
 0x6d7   :  { %v1368_v4 = vpop.f32.mrf.mxu2  ;;  %v1399_v13 = vpop.f32.mrf.mxu3 }
 0x6d8   :  { %v4217_v5 = vpack.i.bf16 %v1368_v4, %v4855_v35  ;;  %v4232_v35 = vpack.i.bf16 %v1399_v13, %v4859_v37 }
 0x6da   :  { %4218 = vxpose.xlu2.b32.cont [2/4] (short) (narrow) %v4217_v5, 8 }
 0x6df   :  { %v1371_v39 = vpop.f32.mrf.mxu2  ;;  %v1401_v14 = vpop.f32.mrf.mxu3 }
 0x6e0   :  { %v4219_v6 = vpack.i.bf16 %v1371_v39, %v4861_v38  ;;  %v4234_v38 = vpack.i.bf16 %v1401_v14, %v4863_v40 }
 0x6e2   :  { %4220 = vxpose.xlu2.b32.cont [3/4] (short) (narrow) %v4219_v6, 8 }
 0x6e7   :  { %v1373_v8 = vpop.f32.mrf.mxu2 }
 0x6e8   :  { %v4221_v9 = vpack.i.bf16 %v1373_v8, %v4865_v41  ;;  %v4201_v41 = vunpack.i.h.bf16 %v4197_v10 }
 0x6ea   :  { %4222 = vxpose.xlu2.b32.end [4/4] (short) (narrow) %v4221_v9, 8  ;;  %v938_v22 = vrot.slane %v4201_v41, 4 }
 0x6f2   :  { %4229 = vxpose.xlu2.b32.start [1/4] (short) (narrow) %v4228_v11, 8 }
 0x6fa   :  { %4231 = vxpose.xlu2.b32.cont [2/4] (short) (narrow) %v4230_v28, 8 }
 0x702   :  { %4233 = vxpose.xlu2.b32.cont [3/4] (short) (narrow) %v4232_v35, 8 }
 0x70a   :  { %4235 = vxpose.xlu2.b32.end [4/4] (short) (narrow) %v4234_v38, 8 }
 0x74f   :  { %v4210_v15 = vpop.trf.xlu1 }
 0x750   :  { %v4214_v17 = vunpack.i.h.bf16 %v4210_v15  ;;  %v4211_v37 = vunpack.i.l.bf16 %v4210_v15 }
 0x752   :  { %v1572_v23 = vrot.slane %v4214_v17, 4  ;;  %v1562_v42 = vrot.slane %v4211_v37, 4 }
 0x76b   :  { %v4223_v16 = vpop.trf.xlu2 }
 0x76c   :  { %v4227_v18 = vunpack.i.h.bf16 %v4223_v16  ;;  %v4224_v19 = vunpack.i.l.bf16 %v4223_v16 }
 0x76e   :  { %v1574_v31 = vrot.slane %v4227_v18, 4  ;;  %v940_v24 = vrot.slane %v4224_v19, 4  ;;  %v939_v40 = vsel %vm926_vm2, %v938_v22, %v4224_v19  ;;  %v1573_v30 = vsel %vm926_vm2, %v1572_v23, %v4227_v18 }
 0x76f   :  { %v945_v44 = vperm.slane %v939_v40, %v4915_v26  ;;  %v1579_v47 = vperm.slane %v1573_v30, %v4915_v26 }
 0x770   :  { %v941_v29 = vsel %vm926_vm2, %v4201_v41, %v940_v24  ;;  %v1575_v32 = vsel %vm926_vm2, %v4214_v17, %v1574_v31 }
 0x771   :  { %v949_v45 = vperm.slane %v941_v29, %v4915_v26  ;;  %v1583_v49 = vperm.slane %v1575_v32, %v4915_v26  ;;  %v950_v57 = vrot.slane %v945_v44, 4  ;;  %v1584_v48 = vrot.slane %v1579_v47, 4 }
 0x773   :  { %v962_v58 = vrot.slane %v949_v45, 4  ;;  %v1596_v60 = vrot.slane %v1583_v49, 4 }
 0x78b   :  { %v4236_v50 = vpop.trf.xlu2 }
 0x78c   :  { %v4240_v51 = vunpack.i.h.bf16 %v4236_v50  ;;  %v4237_v52 = vunpack.i.l.bf16 %v4236_v50 }
 0x78e   :  { %v1560_v46 = vrot.slane %v4240_v51, 4  ;;  %v925_v54 = vrot.slane %v4237_v52, 4  ;;  %v929_v55 = vsel %vm926_vm2, %v4237_v52, %v928_v36  ;;  %v1563_v56 = vsel %vm926_vm2, %v4240_v51, %v1562_v42 }
 0x78f   :  { %v937_v21 = vperm.slane %v929_v55, %v4915_v26  ;;  %v1571_v43 = vperm.slane %v1563_v56, %v4915_v26 }
 0x790   :  { %v927_v61 = vsel %vm926_vm2, %v925_v54, %v4198_v25  ;;  %v1561_v62 = vsel %vm926_vm2, %v1560_v46, %v4211_v37 }
 0x791   :  { %v933_v63 = vperm.slane %v927_v61, %v4915_v26  ;;  %v963_v0 = vsel %vm926_vm2, %v962_v58, %v937_v21  ;;  %v964_v1 = vrot.slane %v937_v21, 4  ;;  %v1567_v2 = vperm.slane %v1561_v62, %v4915_v26 }
 0x792   :  { %v969_v59 = vperm.slane %v963_v0, %v4925_v53  ;;  %v1597_v3 = vsel %vm926_vm2, %v1596_v60, %v1571_v43  ;;  %v1598_v4 = vrot.slane %v1571_v43, 4 }
 0x793   :  { %v951_v5 = vsel %vm926_vm2, %v950_v57, %v933_v63  ;;  %v952_v39 = vrot.slane %v933_v63, 4  ;;  %v965_v6 = vsel %vm926_vm2, %v949_v45, %v964_v1  ;;  %v1585_v7 = vsel %vm926_vm2, %v1584_v48, %v1567_v2 }
 0x794   :  { %v957_v8 = vperm.slane %v951_v5, %v4925_v53  ;;  %v973_v9 = vperm.slane %v965_v6, %v4925_v53  ;;  %v978_v10 = vrot.slane %v969_v59, 4  ;;  %v1586_v11 = vrot.slane %v1567_v2, 4 }
 0x795   :  { %v953_v12 = vsel %vm926_vm2, %v945_v44, %v952_v39  ;;  %v1591_v28 = vperm.slane %v1585_v7, %v4925_v53  ;;  %v1599_v13 = vsel %vm926_vm2, %v1583_v49, %v1598_v4  ;;  %v1603_v35 = vperm.slane %v1597_v3, %v4925_v53 }
 0x796   :  { %v980_v14 = vrot.slane %v973_v9, 4  ;;  %v1587_v38 = vsel %vm926_vm2, %v1579_v47, %v1586_v11  ;;  %v1607_v15 = vperm.slane %v1599_v13, %v4925_v53  ;;  %v961_v16 = vperm.slane %v953_v12, %v4925_v53 }
 0x797   :  { %v1612_v41 = vrot.slane %v1603_v35, 4  ;;  %v974_v17 = vrot.slane %v957_v8, 4  ;;  %v979_v18 = vsel %vm926_vm2, 0.0, %v978_v10  ;;  %v1595_v19 = vperm.slane %v1587_v38, %v4925_v53 }
 0x798   :  { %v1614_v27 = vrot.slane %v1607_v15, 4  ;;  %v976_v20 = vrot.slane %v961_v16, 4  ;;  %v981_v22 = vsel %vm926_vm2, 0.0, %v980_v14  ;;  %v993_v23 = vsel %vm926_vm2, %v980_v14, %v969_v59 }
 0x799   :  { %v975_v31 = vsel %vm926_vm2, 0.0, %v974_v17  ;;  %v997_v24 = vperm.slane %v993_v23, %v4915_v26  ;;  %v998_v25 = vrot.slane %v981_v22, 4  ;;  %v1608_v37 = vrot.slane %v1591_v28, 4 }
 0x79a   :  { %v977_v40 = vsel %vm926_vm2, 0.0, %v976_v20  ;;  %v982_v29 = vsel %vm926_vm2, %v976_v20, %v957_v8  ;;  %v1610_v30 = vrot.slane %v1595_v19, 4  ;;  %v1613_v32 = vsel %vm926_vm2, 0.0, %v1612_v41 }
 0x79b   :  { %v986_v33 = vperm.slane %v982_v29, %v4915_v26  ;;  %v987_v34 = vrot.slane %v977_v40, 4  ;;  %v999_v36 = vsel %vm926_vm2, %v998_v25, %v979_v18  ;;  %v1018_v42 = vrot.slane %v997_v24, 4 }
 0x79c   :  { %v1003_v44 = vperm.slane %v999_v36, %v4915_v26  ;;  %v1609_v45 = vsel %vm926_vm2, 0.0, %v1608_v37  ;;  %v1611_v47 = vsel %vm926_vm2, 0.0, %v1610_v30  ;;  %v1615_v49 = vsel %vm926_vm2, 0.0, %v1614_v27  ;;  %v4080_v36 = vld [vmem:[#allocation8 + $0xe8] sm:$0xff] }
 0x79d   :  { %v988_v50 = vsel %vm926_vm2, %v987_v34, %v975_v31  ;;  %v1006_v51 = vrot.slane %v986_v33, 4  ;;  %v1616_v52 = vsel %vm926_vm2, %v1610_v30, %v1591_v28  ;;  %v1621_v46 = vrot.slane %v1611_v47, 4  ;;  %v4081_v34 = vld [vmem:[#allocation8 + $0xf0] sm:$0xff]  ;;  %v4076_v47 = vld [vmem:[#allocation8 + $0xc8] sm:$0xff] }
 0x79e   :  { %v992_v54 = vperm.slane %v988_v50, %v4915_v26  ;;  %v1019_v55 = vsel %vm926_vm2, %v1003_v44, %v1018_v42  ;;  %v1620_v56 = vperm.slane %v1616_v52, %v4915_v26  ;;  %v1627_v57 = vsel %vm926_vm2, %v1614_v27, %v1603_v35  ;;  %v4079_v42 = vld [vmem:[#allocation8 + $0xe0] sm:$0xff]  ;;  %v4098_v50 = vld [vmem:[#allocation8 + $0x178] sm:$0xff]  ;;  %v4096_v52 = vld [vmem:[#allocation8 + $0x168] sm:$0xff] }
 0x79f   :  { %v1027_v58 = vperm.slane %v1019_v55, %v4925_v53  ;;  %v1622_v21 = vsel %vm926_vm2, %v1621_v46, %v1609_v45  ;;  %v1631_v43 = vperm.slane %v1627_v57, %v4915_v26  ;;  %v1632_v48 = vrot.slane %v1615_v49, 4  ;;  %v4077_v45 = vld [vmem:[#allocation8 + $0xd0] sm:$0xff]  ;;  %v4075_v49 = vld [vmem:[#allocation8 + $0xc0] sm:$0xff]  ;;  %1983 = vmatpush.bf16.msra.mxu3 %v4098_v50 }
 0x7a0   :  { %v1004_v60 = vrot.slane %v992_v54, 4  ;;  %v1007_v61 = vsel %vm926_vm2, %v992_v54, %v1006_v51  ;;  %v1626_v62 = vperm.slane %v1622_v21, %v4915_v26  ;;  %v1640_v63 = vrot.slane %v1620_v56, 4  ;;  %v4097_v51 = vld [vmem:[#allocation8 + $0x170] sm:$0xff]  ;;  %v4095_v46 = vld [vmem:[#allocation8 + $0x160] sm:$0xff]  ;;  %v4094_v54 = vld [vmem:[#allocation8 + $0x158] sm:$0xff] }
 0x7a1   :  { %v1015_v0 = vperm.slane %v1007_v61, %v4925_v53  ;;  %v1032_v1 = vrot.slane %v1027_v58, 4  ;;  %v1633_v2 = vsel %vm926_vm2, %v1632_v48, %v1613_v32  ;;  %v1652_v59 = vrot.slane %v1631_v43, 4  ;;  %v4093_v55 = vld [vmem:[#allocation8 + $0x150] sm:$0xff] }
 0x7a2   :  { %v1637_v3 = vperm.slane %v1633_v2, %v4915_v26  ;;  %v1641_v4 = vsel %vm926_vm2, %v1626_v62, %v1640_v63  ;;  %v1638_v5 = vrot.slane %v1626_v62, 4  ;;  %v1005_v39 = vsel %vm926_vm2, %v1004_v60, %v986_v33  ;;  %v4082_v33 = vld [vmem:[#allocation8 + $0xf8] sm:$0xff]  ;;  %v4091_v62 = vld [vmem:[#allocation8 + $0x140] sm:$0xff]  ;;  %v140_v63 = vld [vmem:[#allocation5] sm:$0xff] }
 0x7a3   :  { %v1034_v6 = vrot.slane %v1015_v0, 4  ;;  %v1649_v7 = vperm.slane %v1641_v4, %v4925_v53  ;;  %v1011_v8 = vperm.slane %v1005_v39, %v4925_v53  ;;  %v1016_v10 = vrot.slane %v1003_v44, 4  ;;  %1735 = vmatpush.bf16.msra.mxu1 %v4082_v33  ;;  %v4078_v44 = vld [vmem:[#allocation8 + $0xd8] sm:$0xff]  ;;  %1984 = vmatpush.bf16.msra.mxu3 %v4097_v51  ;;  %v4085_v50 = vld [vmem:[#allocation8 + $0x110] sm:$0xff]  ;;  %v4084_v51 = vld [vmem:[#allocation8 + $0x108] sm:$0xff] }
 0x7a4   :  { %v1653_v9 = vsel %vm926_vm2, %v1637_v3, %v1652_v59  ;;  %v1639_v11 = vsel %vm926_vm2, %v1638_v5, %v1620_v56  ;;  %v1650_v12 = vrot.slane %v1637_v3, 4  ;;  %v1033_v38 = vsel %vm926_vm2, %v1032_v1, %v1015_v0  ;;  %v4092_v56 = vld [vmem:[#allocation8 + $0x148] sm:$0xff]  ;;  %v141_v0 = vld [vmem:[#allocation5 + $0x8] sm:$0xff] }
 0x7a5   :  { %v1661_v28 = vperm.slane %v1653_v9, %v4925_v53  ;;  %v1668_v13 = vrot.slane %v1649_v7, 4  ;;  %v1035_v35 = vsel %vm926_vm2, %v1027_v58, %v1034_v6  ;;  %v1030_v14 = vrot.slane %v1011_v8, 4  ;;  %v5011_v9 = vld [vmem:[#allocation10] sm:$0xff] }
 0x7a6   :  { %v1017_v15 = vsel %vm926_vm2, %v1016_v10, %v997_v24  ;;  %v1645_v16 = vperm.slane %v1639_v11, %v4925_v53  ;;  %v1651_v41 = vsel %vm926_vm2, %v1650_v12, %v1631_v43  ;;  %v1686_v10 = vperm.slane %v5011_v9, 3 }
 0x7a7   :  { %v1666_v17 = vrot.slane %v1661_v28, 4  ;;  %v1669_v18 = vsel %vm926_vm2, %v1661_v28, %v1668_v13  ;;  %v1023_v19 = vperm.slane %v1017_v15, %v4925_v53  ;;  %v1657_v27 = vperm.slane %v1651_v41, %v4925_v53  ;;  %1736 = vmatpush.bf16.msra.mxu1 %v4081_v34  ;;  %1985 = vmatpush.bf16.msra.mxu3 %v4096_v52  ;;  %v4441_v28 = vld [vmem:[#allocation2] sm:$0xff] }
 0x7a8   :  { %v4251_v20 = vpack.i.bf16 %v1669_v18, %v1035_v35  ;;  %v1664_v22 = vrot.slane %v1645_v16, 4 }
 0x7a9   :  { %v1667_v23 = vsel %vm926_vm2, %v1666_v17, %v1649_v7  ;;  %v1028_v31 = vrot.slane %v1023_v19, 4  ;;  %v1031_v25 = vsel %vm926_vm2, %v1023_v19, %v1030_v14  ;;  %v1662_v37 = vrot.slane %v1657_v27, 4 }
 0x7aa   :  { %v4246_v24 = vpack.i.bf16 %v1667_v23, %v1033_v38  ;;  %4252 = vrot.lane.b32.xlu2 %v4251_v20, %s4659_s7  ;;  %v1665_v40 = vsel %vm926_vm2, %v1657_v27, %v1664_v22  ;;  %v5008_v7 = vpack.c.bf16 %v141_v0, %v140_v63  ;;  %v4442_v38 = vld [vmem:[#allocation2 + $0x8] sm:$0xff]  ;;  %v146_v19 = vlaneseq }
 0x7ab   :  { %v4241_v29 = vpack.i.bf16 %v1665_v40, %v1031_v25  ;;  %v1029_v30 = vsel %vm926_vm2, %v1028_v31, %v1011_v8  ;;  %v1663_v32 = vsel %vm926_vm2, %v1662_v37, %v1645_v16  ;;  %1737 = vmatpush.bf16.msra.mxu1 %v4080_v36  ;;  %1986 = vmatpush.bf16.msra.mxu3 %v4095_v46  ;;  %v1934_v16 = vperm.slane %v5011_v9, 5  ;;  %v4103_v0 = vld [vmem:[#allocation8 + $0x1a0] sm:$0xff] }
 0x7ac   :  { %4247 = vrot.lane.b32.xlu1 %v4246_v24, %s4651_s17  ;;  %v147_v27 = vand.u32 127, %v146_v19  ;;  %v4662_v23 = vmov 0.0   ;;  %v4099_v19 = vld [vmem:[#allocation8 + $0x180] sm:$0xff] }
 0x7ad   :  { %4242 = vrot.lane.b32.xlu0 %v4241_v29, %s4658_s4 }
 0x7ae   :  { %vm148_vm5 = vcmp.lt.s32.totalorder %v147_v27, 32 }
 0x7af   :  { %1738 = vmatpush.bf16.msra.mxu1 %v4079_v42  ;;  %1987 = vmatpush.bf16.msra.mxu3 %v4094_v54  ;;  %v5019_v31 = vsel %vm148_vm5, 1.0, %v4662_v23  ;;  %v4090_v42 = vld [vmem:[#allocation8 + $0x138] sm:$0xff] }
 0x7b0   :  { %1918 = vmatpush.bf16.msra.mxu2 %v4090_v42 }
 0x7b3   :  { %1739 = vmatpush.bf16.msra.mxu1 %v4078_v44  ;;  %1988 = vmatpush.bf16.msra.mxu3 %v4093_v55  ;;  %v4089_v44 = vld [vmem:[#allocation8 + $0x130] sm:$0xff]  ;;  %v4083_v55 = vld [vmem:[#allocation8 + $0x100] sm:$0xff] }
 0x7b4   :  { %1919 = vmatpush.bf16.msra.mxu2 %v4089_v44 }
 0x7b7   :  { %1740 = vmatpush.bf16.msra.mxu1 %v4077_v45  ;;  %1989 = vmatpush.bf16.msra.mxu3 %v4092_v56  ;;  %v4088_v45 = vld [vmem:[#allocation8 + $0x128] sm:$0xff]  ;;  %v4106_v56 = vld [vmem:[#allocation8 + $0x1b8] sm:$0xff] }
 0x7b8   :  { %1920 = vmatpush.bf16.msra.mxu2 %v4088_v45  ;;  %2046 = vmatpush.bf16.msrb.mxu0 %v4106_v56 }
 0x7bb   :  { %1741 = vmatpush.bf16.msra.mxu1 %v4076_v47  ;;  %1990 = vmatpush.bf16.msra.mxu3 %v4091_v62  ;;  %v4087_v47 = vld [vmem:[#allocation8 + $0x120] sm:$0xff] }
 0x7bc   :  { %1921 = vmatpush.bf16.msra.mxu2 %v4087_v47 }
 0x7be   :  { %1991 = vmatmul.bf16.vlgmr.msra.gmra.mxu3 %v5008_v7 }
 0x7bf   :  { %1742 = vmatpush.bf16.msra.mxu1 %v4075_v49  ;;  %v4086_v49 = vld [vmem:[#allocation8 + $0x118] sm:$0xff] }
 0x7c0   :  { %1922 = vmatpush.bf16.msra.mxu2 %v4086_v49 }
 0x7c4   :  { %1923 = vmatpush.bf16.msra.mxu2 %v4085_v50 }
 0x7c8   :  { %1924 = vmatpush.bf16.msra.mxu2 %v4084_v51 }
 0x7cc   :  { %1925 = vmatpush.bf16.msra.mxu2 %v4083_v55 }
 0x804   :  { %v4253_v58 = vpop.permute.xlu2 %4252 }
 0x805   :  { %v4255_v1 = vunpack.i.h.bf16 %v4253_v58  ;;  %v4254_v2 = vunpack.i.l.bf16 %v4253_v58 }
 0x81e   :  { %v4248_v57 = vpop.permute.xlu1 %4247 }
 0x81f   :  { %v4243_v21 = vpop.permute.xlu0 %4242  ;;  %v4250_v60 = vunpack.i.h.bf16 %v4248_v57  ;;  %v4249_v61 = vunpack.i.l.bf16 %v4248_v57 }
 0x820   :  { %v4245_v43 = vunpack.i.h.bf16 %v4243_v21  ;;  %v4244_v48 = vunpack.i.l.bf16 %v4243_v21  ;;  %v4105_v21 = vld [vmem:[#allocation8 + $0x1b0] sm:$0xff] }
 0x821   :  { %2047 = vmatpush.bf16.msrb.mxu0 %v4105_v21 }
 0x822   :  { %v1048_v59 = vsel %vm507_vm0, %v1029_v30, %v4244_v48  ;;  %v1682_v3 = vsel %vm507_vm0, %v1663_v32, %v4245_v43 }
 0x823   :  { %v1050_v4 = vsel %vm1049_vm3, %v1048_v59, %v4249_v61  ;;  %v1683_v5 = vsel %vm1049_vm3, %v1682_v3, %v4250_v60  ;;  %v4104_v61 = vld [vmem:[#allocation8 + $0x1a8] sm:$0xff] }
 0x824   :  { %v1052_v39 = vsel %vm1051_vm4, %v1050_v4, %v4254_v2  ;;  %v1684_v6 = vsel %vm1051_vm4, %v1683_v5, %v4255_v1  ;;  %v4102_v4 = vld [vmem:[#allocation8 + $0x198] sm:$0xff] }
 0x825   :  { %v1685_v8 = vpack.c.bf16 %v1684_v6, %v1052_v39  ;;  %2048 = vmatpush.bf16.msrb.mxu0 %v4104_v61 }
 0x827   :  { %1743 = vmatmul.bf16.vlgmr.msra.gmra.mxu1 %v1685_v8  ;;  %v144_v8 = vld [vmem:[#allocation10 + $0x8] sm:$0x7f] }
 0x829   :  { %2049 = vmatpush.bf16.msrb.mxu0 %v4103_v0 }
 0x82d   :  { %2050 = vmatpush.bf16.msrb.mxu0 %v4102_v4 }
 0x841   :  { %v1992_v41 = vpop.f32.mrf.mxu3 }
 0x842   :  { %v1993_v17 = vadd.f32 %v1992_v41, %v1934_v16  ;;  %v1796_v41 = vperm.slane %v144_v8, 1 }
 0x844   :  { %v2062_v18 = vpack.c.bf16 %v1993_v17, %v1993_v17 }
 0x8a4   :  { %v1744_v11 = vpop.f32.mrf.mxu1 }
 0x8a5   :  { %v1745_v12 = vadd.f32 %v1744_v11, %v1686_v10 }
 0x8a7   :  { %v1749_v13 = vadd.f32 %v4441_v28, %v1745_v12  ;;  %v1793_v28 = vperm.slane %v144_v8, 0 }
 0x8a9   :  { %1751 = vadd.xlane.f32.xlu1 %v1749_v13 }
 0x8ac   :  { %v1746_v35 = vpop.f32.mrf.mxu1 }
 0x8ad   :  { %v1747_v14 = vadd.f32 %v1746_v35, %v1686_v10  ;;  %v4101_v10 = vld [vmem:[#allocation8 + $0x190] sm:$0xff] }
 0x8ae   :  { %2051 = vmatpush.bf16.msrb.mxu0 %v4101_v10 }
 0x8af   :  { %v1750_v15 = vadd.f32 %v4442_v38, %v1747_v14  ;;  %v4100_v14 = vld [vmem:[#allocation8 + $0x188] sm:$0xff] }
 0x8b1   :  { %1753 = vadd.xlane.f32.xlu0 %v1750_v15 }
 0x8b2   :  { %2052 = vmatpush.bf16.msrb.mxu0 %v4100_v14 }
 0x8b6   :  { %2053 = vmatpush.bf16.msrb.mxu0 %v4099_v19 }
 0x8b9   :  { %2054 = vmatmul.bf16.vlgmr.msrb.gmra.mxu0 %v5008_v7 }
 0x8c5   :  { %2074 = vrot.lane.b32.xlu0 %v2062_v18, %s4659_s7 }
 0x8cd   :  { %2080 = vrot.lane.b32.xlu0 %v2062_v18, %s4658_s4 }
 0x91c   :  { %v1752_v20 = vpop.xlane.xlu1 %1751 }
 0x91d   :  { %v1755_v22 = vmul.f32 0.03125, %v1752_v20 }
 0x91f   :  { %v1757_v25 = vsub.f32 %v1749_v13, %v1755_v22 }
 0x921   :  { %v5022_v37 = vmul.f32 %v5019_v31, %v1757_v25 }
 0x923   :  { %v1761_v24 = vmul.f32 %v5022_v37, %v5022_v37 }
 0x924   :  { %v1754_v40 = vpop.xlane.xlu0 %1753 }
 0x925   :  { %v1756_v29 = vmul.f32 0.03125, %v1754_v40  ;;  %1763 = vadd.xlane.f32.xlu2 %v1761_v24  ;;  %v1869_v24 = vperm.slane %v5011_v9, 4 }
 0x927   :  { %v1758_v30 = vsub.f32 %v1750_v15, %v1756_v29 }
 0x929   :  { %v5027_v32 = vmul.f32 %v5019_v31, %v1758_v30 }
 0x92b   :  { %v1762_v33 = vmul.f32 %v5027_v32, %v5027_v32 }
 0x92d   :  { %1765 = vadd.xlane.f32.xlu1 %v1762_v33 }
 0x936   :  { %v2055_v33 = vpop.f32.mrf.mxu0 }
 0x937   :  { %v5032_v34 = vpop.permute.xlu0 %2074 }
 0x93e   :  { %v5065_v61 = vpop.f32.mrf.mxu0 }
 0x93f   :  { %v2081_v36 = vpop.permute.xlu0 %2080 }
 0x946   :  { %2077 = vrot.lane.b32.xlu1 %v2062_v18, %s4651_s17 }
 0x97b   :  { %4261 = vxpose.binary.xlu1.c.b16.start.end [1/2] (short) (narrow) %v2081_v36, %v2062_v18, 32 }
 0x998   :  { %v1764_v52 = vpop.xlane.xlu2 %1763 }
 0x999   :  { %v1767_v46 = vmul.f32 0.03125, %v1764_v52 }
 0x99b   :  { %v1769_v54 = vadd.f32 1e-05, %v1767_v46 }
 0x99d   :  { %4396 = vrsqrt.f32 %v1769_v54  ;;  %vm1777_vm7 = vweird.f32 %v1769_v54 }
 0x9a0   :  { %v1766_v57 = vpop.xlane.xlu1 %1765 }
 0x9a1   :  { %v1768_v58 = vmul.f32 0.03125, %v1766_v57 }
 0x9a3   :  { %v4397_v43 = vpop.eup %4396  ;;  %v1770_v48 = vadd.f32 1e-05, %v1768_v58  ;;  %v1994_v58 = vpop.f32.mrf.mxu3 }
 0x9a4   :  { %v1772_v60 = vmul.f32 %v4397_v43, %v1769_v54  ;;  %vm1778_vm6 = vweird.f32 %v4397_v43 }
 0x9a5   :  { %4398 = vrsqrt.f32 %v1770_v48  ;;  %vm1779_vm8 = vmor %vm1777_vm7, %vm1778_vm6  ;;  %vm1787_vm10 = vweird.f32 %v1770_v48 }
 0x9a6   :  { %v1773_v62 = vmul.f32 %v4397_v43, %v1772_v60 }
 0x9a8   :  { %v1774_v63 = vmul.f32 0.5, %v1773_v62  ;;  %v1995_v62 = vadd.f32 %v1994_v58, %v1934_v16 }
 0x9aa   :  { %v1775_v1 = vsub.f32 1.5, %v1774_v63  ;;  %v2063_v63 = vpack.c.bf16 %v1995_v62, %v1995_v62 }
 0x9ab   :  { %v4399_v2 = vpop.eup %4398 }
 0x9ac   :  { %v1776_v59 = vmul.f32 %v4397_v43, %v1775_v1  ;;  %v1782_v3 = vmul.f32 %v4399_v2, %v1770_v48  ;;  %vm1788_vm9 = vweird.f32 %v4399_v2 }
 0x9ad   :  { %vm1789_vm11 = vmor %vm1787_vm10, %vm1788_vm9 }
 0x9ae   :  { %v1783_v5 = vmul.f32 %v4399_v2, %v1782_v3  ;;  %v1780_v39 = vsel %vm1779_vm8, %v4397_v43, %v1776_v59 }
 0x9af   :  { %v1791_v12 = vmul.f32 %v1780_v39, %v5022_v37 }
 0x9b0   :  { %v1784_v6 = vmul.f32 0.5, %v1783_v5 }
 0x9b1   :  { %v1794_v15 = vmul.f32 %v1793_v28, %v1791_v12 }
 0x9b2   :  { %v1785_v11 = vsub.f32 1.5, %v1784_v6 }
 0x9b3   :  { %v5037_v27 = vadd.f32 %v1796_v41, %v1794_v15 }
 0x9b4   :  { %v1786_v13 = vmul.f32 %v4399_v2, %v1785_v11 }
 0x9b6   :  { %v1790_v35 = vsel %vm1789_vm11, %v4399_v2, %v1786_v13 }
 0x9b7   :  { %v1792_v38 = vmul.f32 %v1790_v35, %v5027_v32  ;;  %v1997_v32 = vperm.slane %v5011_v9, 6 }
 0x9b8   :  { %v2078_v17 = vpop.permute.xlu1 %2077 }
 0x9b9   :  { %v1795_v18 = vmul.f32 %v1793_v28, %v1792_v38  ;;  %4256 = vxpose.binary.xlu0.c.b16.start.end [1/2] (short) (narrow) %v5032_v34, %v2078_v17, 32  ;;  %v2056_v7 = vadd.f32 %v2055_v33, %v1997_v32 }
 0x9bb   :  { %v5039_v20 = vadd.f32 %v1796_v41, %v1795_v18  ;;  %v5053_v36 = vpack.c.bf16 %v2056_v7, %v2056_v7 }
 0x9bd   :  { %v1867_v22 = vpack.c.bf16 %v5039_v20, %v5037_v27 }
 0x9bf   :  { %1926 = vmatmul.bf16.vlgmr.msra.gmra.mxu2 %v1867_v22 }
 0xa27   :  { %v4262_v23 = vpop.trf.xlu1 }
 0xa2f   :  { %v4263_v25 = vpop.trf.xlu1 }
 0xa37   :  { %v4264_v37 = vpop.trf.xlu1 }
 0xa38   :  { %2166 = vmatpush.bf16.msrb.mxu1 %v4264_v37 }
 0xa3c   :  { %2167 = vmatpush.bf16.msrb.mxu1 %v4262_v23 }
 0xa3f   :  { %v4265_v42 = vpop.trf.xlu1 }
 0xa40   :  { %2214 = vmatpush.bf16.msra.mxu0 %v4265_v42 }
 0xa42   :  { %v1927_v40 = vpop.f32.mrf.mxu2 }
 0xa43   :  { %v1928_v29 = vadd.f32 %v1927_v40, %v1869_v24 }
 0xa44   :  { %2215 = vmatpush.bf16.msra.mxu0 %v4263_v25 }
 0xa45   :  { %v1932_v30 = vmul.f32 0.35355338, %v1928_v29 }
 0xa47   :  { %v2060_v34 = vpack.c.bf16 %v1932_v30, %v1932_v30 }
 0xa49   :  { %2067 = vrot.lane.b32.xlu1 %v2060_v34, %s4659_s7  ;;  %2069 = vrot.lane.b32.xlu2 %v2060_v34, %s4651_s17 }
 0xa4a   :  { %3931 = vmatmul.msk.bf16.vlgmr.msrb.gmra.mxu1 %vm507_vm0, %v2060_v34  ;;  %v1929_v60 = vpop.f32.mrf.mxu2 }
 0xa4b   :  { %v1930_v30 = vadd.f32 %v1929_v60, %v1869_v24 }
 0xa51   :  { %2071 = vrot.lane.b32.xlu1 %v2060_v34, %s4658_s4  ;;  %2087 = vrot.lane.b32.xlu2 %v5053_v36, %s4651_s17  ;;  %v1933_v34 = vmul.f32 0.35355338, %v1930_v30 }
 0xa53   :  { %v5084_v7 = vpack.c.bf16 %v1933_v34, %v1933_v34 }
 0xa59   :  { %2084 = vrot.lane.b32.xlu2 %v5053_v36, %s4659_s7 }
 0xa65   :  { %v4257_v44 = vpop.trf.xlu0 }
 0xa6d   :  { %v4258_v45 = vpop.trf.xlu0 }
 0xa75   :  { %v4259_v47 = vpop.trf.xlu0 }
 0xa76   :  { %2198 = vmatpush.bf16.msrb.mxu3 %v4259_v47 }
 0xa7a   :  { %2199 = vmatpush.bf16.msrb.mxu3 %v4257_v44 }
 0xa7d   :  { %v4260_v49 = vpop.trf.xlu0 }
 0xa7e   :  { %2182 = vmatpush.bf16.msrb.mxu2 %v4260_v49 }
 0xa82   :  { %2183 = vmatpush.bf16.msrb.mxu2 %v4258_v45 }
 0xaa3   :  { %v2070_v50 = vpop.permute.xlu2 %2069 }
 0xaa4   :  { %3933 = vmatmul.msk.bf16.vlgmr.msrb.gmra.mxu3 %vm507_vm0, %v2070_v50 }
 0xaab   :  { %v2088_v51 = vpop.permute.xlu2 %2087 }
 0xab3   :  { %v2085_v52 = vpop.permute.xlu2 %2084 }
 0xab4   :  { %4266 = vxpose.binary.xlu1.c.b16.start.end [1/2] (short) (narrow) %v2085_v52, %v2088_v51, 32 }
 0xabb   :  { %v2068_v46 = vpop.permute.xlu1 %2067 }
 0xabc   :  { %3932 = vmatmul.msk.bf16.vlgmr.msrb.gmra.mxu2 %vm507_vm0, %v2068_v46 }
 0xac3   :  { %v2072_v54 = vpop.permute.xlu1 %2071 }
 0xac4   :  { %3934 = vmatmul.msk.bf16.vlgmr.msra.gmra.mxu0 %vm507_vm0, %v2072_v54 }
 0xac7   :  { %v2169_v55 = vpop.f32.mrf.mxu1 }
 0xac8   :  { %v2221_v56 = vsel %vm572_vm1, %v2169_v55, -inf }
 0xac9   :  { %2222 = vmax.xlane.f32.xlu2 %v2221_v56 }
 0xacf   :  { %v2171_v57 = vpop.f32.mrf.mxu1 }
 0xb27   :  { %v2201_v21 = vpop.f32.mrf.mxu3 }
 0xb28   :  { %v2227_v43 = vsel %vm572_vm1, %v2201_v21, -inf }
 0xb29   :  { %2228 = vmax.xlane.f32.xlu2 %v2227_v43 }
 0xb2f   :  { %v2203_v48 = vpop.f32.mrf.mxu3 }
 0xb3c   :  { %v2223_v16 = vpop.xlane.xlu2 %2222 }
 0xb3d   :  { %v2233_v5 = vsub.f32 %v2169_v55, %v2223_v16 }
 0xb3f   :  { %v2185_v0 = vpop.f32.mrf.mxu2  ;;  %v2237_v39 = vmul.f32 1.442695, %v2233_v5 }
 0xb40   :  { %v2224_v1 = vsel %vm572_vm1, %v2185_v0, -inf }
 0xb41   :  { %v2217_v2 = vpop.f32.mrf.mxu0  ;;  %2706 = vrot.lane.b32.xlu2 %v2063_v63, %s4659_s7  ;;  %2225 = vmax.xlane.f32.xlu0 %v2224_v1  ;;  %4400 = vpow2.f32 %v2237_v39  ;;  %v2058_v1 = vadd.f32 %v5065_v61, %v1997_v32 }
 0xb42   :  { %v2230_v59 = vsel %vm572_vm1, %v2217_v2, -inf }
 0xb43   :  { %2231 = vmax.xlane.f32.xlu1 %v2230_v59 }
 0xb47   :  { %v2187_v3 = vpop.f32.mrf.mxu2  ;;  %v4401_v6 = vpop.eup %4400 }
 0xb48   :  { %v2245_v8 = vsel %vm572_vm1, %v4401_v6, 0.0 }
 0xb49   :  { %v2219_v4 = vpop.f32.mrf.mxu0 }
 0xb55   :  { %2090 = vrot.lane.b32.xlu0 %v5053_v36, %s4658_s4 }
 0xb5c   :  { %2709 = vrot.lane.b32.xlu1 %v2063_v63, %s4651_s17 }
 0xb60   :  { %v4267_v10 = vpop.trf.xlu1 }
 0xb64   :  { %2712 = vrot.lane.b32.xlu1 %v2063_v63, %s4658_s4 }
 0xb68   :  { %v5077_v11 = vpop.trf.xlu1 }
 0xb70   :  { %v4269_v35 = vpop.trf.xlu1 }
 0xb78   :  { %v4270_v15 = vpop.trf.xlu1 }
 0xb8e   :  { %2246 = vadd.xlane.f32.xlu1 %v2245_v8 }
 0xb9c   :  { %v2229_v12 = vpop.xlane.xlu2 %2228 }
 0xb9d   :  { %v2235_v28 = vsub.f32 %v2201_v21, %v2229_v12 }
 0xb9f   :  { %v2241_v13 = vmul.f32 1.442695, %v2235_v28 }
 0xba1   :  { %4402 = vpow2.f32 %v2241_v13 }
 0xba4   :  { %v2707_v45 = vpop.permute.xlu2 %2706 }
 0xba7   :  { %v4403_v14 = vpop.eup %4402 }
 0xba8   :  { %v2251_v38 = vsel %vm572_vm1, %v4403_v14, 0.0 }
 0xba9   :  { %2252 = vadd.xlane.f32.xlu2 %v2251_v38 }
 0xbb4   :  { %v2226_v41 = vpop.xlane.xlu0 %2225 }
 0xbb5   :  { %v2234_v17 = vsub.f32 %v2185_v0, %v2226_v41 }
 0xbb6   :  { %v2232_v18 = vpop.xlane.xlu1 %2231 }
 0xbb7   :  { %v2239_v19 = vmul.f32 1.442695, %v2234_v17  ;;  %v2236_v22 = vsub.f32 %v2217_v2, %v2232_v18  ;;  %v5105_v2 = vpack.c.bf16 %v2058_v1, %v2058_v1 }
 0xbb9   :  { %4404 = vpow2.f32 %v2239_v19  ;;  %v2243_v23 = vmul.f32 1.442695, %v2236_v22 }
 0xbbb   :  { %4406 = vpow2.f32 %v2243_v23 }
 0xbbf   :  { %v4405_v25 = vpop.eup %4404 }
 0xbc0   :  { %v2248_v37 = vsel %vm572_vm1, %v4405_v25, 0.0 }
 0xbc1   :  { %v4407_v40 = vpop.eup %4406  ;;  %2249 = vadd.xlane.f32.xlu2 %v2248_v37 }
 0xbc2   :  { %v2254_v29 = vsel %vm572_vm1, %v4407_v40, 0.0 }
 0xbc3   :  { %2255 = vadd.xlane.f32.xlu0 %v2254_v29 }
 0xbc7   :  { %v2091_v44 = vpop.permute.xlu0 %2090 }
 0xbce   :  { %v2710_v33 = vpop.permute.xlu1 %2709 }
 0xbd6   :  { %v2713_v42 = vpop.permute.xlu1 %2712 }
 0xbd7   :  { %4281 = vxpose.binary.xlu1.c.b16.start.end [1/2] (short) (narrow) %v2713_v42, %v2063_v63, 32 }
 0xbd8   :  { %2701 = vrot.lane.b32.xlu0 %v5084_v7, %s4651_s17 }
 0xbe0   :  { %2699 = vrot.lane.b32.xlu0 %v5084_v7, %s4659_s7 }
 0xbea   :  { %4271 = vxpose.binary.xlu2.c.b16.start.end [1/2] (short) (narrow) %v2091_v44, %v5053_v36, 32 }
 0xc01   :  { %v2247_v47 = vpop.xlane.xlu1 %2246 }
 0xc02   :  { %4408 = vrcp.f32 %v2247_v47  ;;  %4276 = vxpose.binary.xlu0.c.b16.start.end [1/2] (short) (narrow) %v2707_v45, %v2710_v33, 32 }
 0xc08   :  { %v4409_v24 = vpop.eup %4408 }
 0xc09   :  { %v2261_v49 = vmul.f32 %v4409_v24, %v4401_v6 }
 0xc0b   :  { %v2265_v50 = vpack.c.bf16 %v2261_v49, %v2261_v49 }
 0xc0d   :  { %v2340_v51 = vsel %vm572_vm1, %v2265_v50, 0 }
 0xc0e   :  { %2349 = vmatpush.bf16.xpose.msra.mxu1 %v2340_v51 }
 0xc1c   :  { %v2253_v52 = vpop.xlane.xlu2 %2252 }
 0xc1d   :  { %4410 = vrcp.f32 %v2253_v52 }
 0xc23   :  { %v4411_v46 = vpop.eup %4410 }
 0xc24   :  { %v2263_v54 = vmul.f32 %v4411_v46, %v4403_v14 }
 0xc26   :  { %v2267_v55 = vpack.c.bf16 %v2263_v54, %v2263_v54 }
 0xc28   :  { %v2396_v56 = vsel %vm572_vm1, %v2267_v55, 0 }
 0xc29   :  { %2405 = vmatpush.bf16.xpose.msra.mxu3 %v2396_v56 }
 0xc30   :  { %3939 = vmatmul.msk.bf16.vlgmr.msra.gmra.mxu3 %vm572_vm1, %v4267_v10 }
 0xc34   :  { %v2250_v36 = vpop.xlane.xlu2 %2249 }
 0xc35   :  { %4412 = vrcp.f32 %v2250_v36 }
 0xc36   :  { %v2256_v57 = vpop.xlane.xlu0 %2255 }
 0xc37   :  { %4414 = vrcp.f32 %v2256_v57 }
 0xc3b   :  { %v4413_v58 = vpop.eup %4412 }
 0xc3c   :  { %v2262_v21 = vmul.f32 %v4413_v58, %v4405_v25 }
 0xc3d   :  { %v4415_v43 = vpop.eup %4414 }
 0xc3e   :  { %v2266_v48 = vpack.c.bf16 %v2262_v21, %v2262_v21  ;;  %v2264_v60 = vmul.f32 %v4415_v43, %v4407_v40 }
 0xc40   :  { %3940 = vmatmul.msk.bf16.gmra.mxu3 %vm572_vm1, %v4269_v35  ;;  %v2368_v62 = vsel %vm572_vm1, %v2266_v48, 0  ;;  %v2268_v63 = vpack.c.bf16 %v2264_v60, %v2264_v60 }
 0xc41   :  { %2377 = vmatpush.bf16.xpose.msra.mxu2 %v2368_v62 }
 0xc42   :  { %v2424_v0 = vsel %vm572_vm1, %v2268_v63, 0 }
 0xc43   :  { %2433 = vmatpush.bf16.xpose.msrb.mxu0 %v2424_v0 }
 0xc48   :  { %3937 = vmatmul.msk.bf16.vlgmr.msra.gmra.mxu2 %vm572_vm1, %v5077_v11 }
 0xc4a   :  { %v2702_v6 = vpop.permute.xlu0 %2701 }
 0xc52   :  { %v2700_v61 = vpop.permute.xlu0 %2699 }
 0xc58   :  { %3938 = vmatmul.msk.bf16.gmra.mxu2 %vm572_vm1, %v4270_v15 }
 0xc63   :  { %2703 = vrot.lane.b32.xlu2 %v5084_v7, %s4658_s4 }
 0xc80   :  { %2719 = vrot.lane.b32.xlu0 %v5105_v2, %s4651_s17 }
 0xc83   :  { %v4282_v59 = vpop.trf.xlu1 }
 0xc8b   :  { %v4272_v3 = vpop.trf.xlu2  ;;  %v4283_v4 = vpop.trf.xlu1 }
 0xc8c   :  { %3935 = vmatmul.msk.bf16.vlgmr.msra.gmra.mxu1 %vm572_vm1, %v4272_v3 }
 0xc93   :  { %v4273_v16 = vpop.trf.xlu2  ;;  %v4284_v5 = vpop.trf.xlu1 }
 0xc94   :  { %3941 = vmatmul.msk.bf16.vlgmr.msrb.gmra.mxu0 %vm572_vm1, %v4273_v16  ;;  %2798 = vmatpush.bf16.msrb.mxu1 %v4284_v5 }
 0xc98   :  { %2799 = vmatpush.bf16.msrb.mxu1 %v4282_v59 }
 0xc9b   :  { %v4274_v39 = vpop.trf.xlu2  ;;  %v4285_v9 = vpop.trf.xlu1 }
 0xc9c   :  { %3936 = vmatmul.msk.bf16.gmra.mxu1 %vm572_vm1, %v4274_v39  ;;  %2846 = vmatpush.bf16.msra.mxu0 %v4285_v9 }
 0xca0   :  { %2847 = vmatpush.bf16.msra.mxu0 %v4283_v4 }
 0xca3   :  { %v4275_v32 = vpop.trf.xlu2 }
 0xca4   :  { %3942 = vmatmul.msk.bf16.gmra.mxu0 %vm572_vm1, %v4275_v32 }
 0xcac   :  { %3943 = vmatmul.msk.bf16.vlgmr.msrb.gmra.mxu1 %vm507_vm0, %v5084_v7 }
 0xcae   :  { %v4277_v8 = vpop.trf.xlu0 }
 0xcb3   :  { %v5138_v23 = vpop.f32.mrf.mxu3 }
 0xcb6   :  { %v4278_v10 = vpop.trf.xlu0 }
 0xcbb   :  { %v5147_v33 = vpop.f32.mrf.mxu3 }
 0xcbd   :  { %v2704_v11 = vpop.permute.xlu2 %2703 }
 0xcbe   :  { %v4279_v12 = vpop.trf.xlu0  ;;  %3946 = vmatmul.msk.bf16.vlgmr.msra.gmra.mxu0 %vm507_vm0, %v2704_v11 }
 0xcbf   :  { %2830 = vmatpush.bf16.msrb.mxu3 %v4279_v12 }
 0xcc3   :  { %2831 = vmatpush.bf16.msrb.mxu3 %v4277_v8  ;;  %v5151_v42 = vpop.f32.mrf.mxu3 }
 0xcc6   :  { %3945 = vmatmul.msk.bf16.vlgmr.msrb.gmra.mxu3 %vm507_vm0, %v2702_v6  ;;  %v4280_v28 = vpop.trf.xlu0 }
 0xcc7   :  { %2814 = vmatpush.bf16.msrb.mxu2 %v4280_v28 }
 0xccb   :  { %2815 = vmatpush.bf16.msrb.mxu2 %v4278_v10  ;;  %v5145_v30 = vpop.f32.mrf.mxu2  ;;  %v5156_v24 = vpop.f32.mrf.mxu3 }
 0xcce   :  { %3944 = vmatmul.msk.bf16.vlgmr.msrb.gmra.mxu2 %vm507_vm0, %v2700_v61 }
 0xcd3   :  { %v5149_v7 = vpop.f32.mrf.mxu2 }
 0xcdb   :  { %v5154_v47 = vpop.f32.mrf.mxu2 }
 0xce3   :  { %v5158_v50 = vpop.f32.mrf.mxu2 }
 0xcf2   :  { %v2720_v63 = vpop.permute.xlu0 %2719 }
 0xd09   :  { %v5118_v13 = vpop.f32.mrf.mxu1 }
 0xd11   :  { %v5120_v35 = vpop.f32.mrf.mxu1  ;;  %v5122_v14 = vpop.f32.mrf.mxu0 }
 0xd12   :  { %v4296_v38 = vpack.i.bf16 %v5122_v14, %v5118_v13 }
 0xd19   :  { %v5126_v15 = vpop.f32.mrf.mxu1  ;;  %v5128_v41 = vpop.f32.mrf.mxu0 }
 0xd1a   :  { %v4298_v17 = vpack.i.bf16 %v5128_v41, %v5120_v35 }
 0xd21   :  { %v5132_v18 = vpop.f32.mrf.mxu1  ;;  %v5134_v19 = vpop.f32.mrf.mxu0 }
 0xd22   :  { %v4300_v22 = vpack.i.bf16 %v5134_v19, %v5126_v15 }
 0xd29   :  { %v2801_v25 = vpop.f32.mrf.mxu1  ;;  %v5140_v37 = vpop.f32.mrf.mxu0 }
 0xd2a   :  { %v2853_v40 = vsel %vm572_vm1, %v2801_v25, -inf  ;;  %v4302_v29 = vpack.i.bf16 %v5140_v37, %v5132_v18 }
 0xd2b   :  { %2854 = vmax.xlane.f32.xlu2 %v2853_v40 }
 0xd31   :  { %v2803_v34 = vpop.f32.mrf.mxu1 }
 0xd3b   :  { %v2849_v44 = vpop.f32.mrf.mxu0 }
 0xd3c   :  { %v2862_v45 = vsel %vm572_vm1, %v2849_v44, -inf }
 0xd3d   :  { %2863 = vmax.xlane.f32.xlu1 %v2862_v45 }
 0xd43   :  { %v2851_v49 = vpop.f32.mrf.mxu0 }
 0xd49   :  { %v2833_v51 = vpop.f32.mrf.mxu3 }
 0xd4a   :  { %v2859_v52 = vsel %vm572_vm1, %v2833_v51, -inf }
 0xd4b   :  { %2860 = vmax.xlane.f32.xlu0 %v2859_v52 }
 0xd51   :  { %v2817_v46 = vpop.f32.mrf.mxu2  ;;  %v2835_v54 = vpop.f32.mrf.mxu3 }
 0xd52   :  { %v2856_v55 = vsel %vm572_vm1, %v2817_v46, -inf }
 0xd53   :  { %2857 = vmax.xlane.f32.xlu1 %v2856_v55 }
 0xd59   :  { %v2819_v56 = vpop.f32.mrf.mxu2 }
 0xd5f   :  { %2722 = vrot.lane.b32.xlu0 %v5105_v2, %s4658_s4 }
 0xd6c   :  { %2716 = vrot.lane.b32.xlu1 %v5105_v2, %s4659_s7 }
 0xd9e   :  { %v2855_v36 = vpop.xlane.xlu2 %2854 }
 0xd9f   :  { %v2865_v57 = vsub.f32 %v2801_v25, %v2855_v36 }
 0xda1   :  { %v2869_v58 = vmul.f32 1.442695, %v2865_v57 }
 0xda3   :  { %4416 = vpow2.f32 %v2869_v58 }
 0xda9   :  { %v4417_v21 = vpop.eup %4416 }
 0xdaa   :  { %v2877_v43 = vsel %vm572_vm1, %v4417_v21, 0.0 }
 0xdab   :  { %2878 = vadd.xlane.f32.xlu2 %v2877_v43 }
 0xdb0   :  { %v2864_v48 = vpop.xlane.xlu1 %2863 }
 0xdb1   :  { %v2868_v60 = vsub.f32 %v2849_v44, %v2864_v48 }
 0xdb3   :  { %v2875_v62 = vmul.f32 1.442695, %v2868_v60 }
 0xdb5   :  { %4418 = vpow2.f32 %v2875_v62 }
 0xdbb   :  { %v4419_v0 = vpop.eup %4418 }
 0xdbc   :  { %v2886_v1 = vsel %vm572_vm1, %v4419_v0, 0.0 }
 0xdbd   :  { %2887 = vadd.xlane.f32.xlu0 %v2886_v1 }
 0xdbe   :  { %v2861_v59 = vpop.xlane.xlu0 %2860 }
 0xdbf   :  { %v2867_v3 = vsub.f32 %v2833_v51, %v2861_v59 }
 0xdc1   :  { %v2873_v4 = vmul.f32 1.442695, %v2867_v3 }
 0xdc3   :  { %4420 = vpow2.f32 %v2873_v4 }
 0xdc6   :  { %v2858_v16 = vpop.xlane.xlu1 %2857 }
 0xdc7   :  { %v2866_v5 = vsub.f32 %v2817_v46, %v2858_v16 }
 0xdc9   :  { %v4421_v39 = vpop.eup %4420  ;;  %v2871_v9 = vmul.f32 1.442695, %v2866_v5 }
 0xdca   :  { %v2883_v6 = vsel %vm572_vm1, %v4421_v39, 0.0 }
 0xdcb   :  { %4422 = vpow2.f32 %v2871_v9  ;;  %2884 = vadd.xlane.f32.xlu2 %v2883_v6 }
 0xdd1   :  { %v4423_v32 = vpop.eup %4422  ;;  %v2723_v61 = vpop.permute.xlu0 %2722 }
 0xdd2   :  { %4291 = vxpose.binary.xlu1.c.b16.start.end [1/2] (short) (narrow) %v2723_v61, %v5105_v2, 32  ;;  %v2880_v8 = vsel %vm572_vm1, %v4423_v32, 0.0 }
 0xdd3   :  { %2881 = vadd.xlane.f32.xlu2 %v2880_v8 }
 0xdde   :  { %v2717_v10 = vpop.permute.xlu1 %2716 }
 0xdfc   :  { %4286 = vxpose.binary.xlu2.c.b16.start.end [1/2] (short) (narrow) %v2717_v10, %v2720_v63, 32 }
 0xe13   :  { %4297 = vxpose.xlu2.b32.start [1/4] (short) (narrow) %v4296_v38, 8 }
 0xe1b   :  { %4299 = vxpose.xlu2.b32.cont [2/4] (short) (narrow) %v4298_v17, 8 }
 0xe1e   :  { %v2879_v11 = vpop.xlane.xlu2 %2878 }
 0xe1f   :  { %4424 = vrcp.f32 %v2879_v11 }
 0xe23   :  { %4301 = vxpose.xlu2.b32.cont [3/4] (short) (narrow) %v4300_v22, 8 }
 0xe25   :  { %v4425_v2 = vpop.eup %4424 }
 0xe26   :  { %v2893_v12 = vmul.f32 %v4425_v2, %v4417_v21 }
 0xe28   :  { %v2897_v28 = vpack.c.bf16 %v2893_v12, %v2893_v12 }
 0xe2a   :  { %v2972_v25 = vsel %vm572_vm1, %v2897_v28, 0 }
 0xe2b   :  { %4303 = vxpose.xlu2.b32.end [4/4] (short) (narrow) %v4302_v29, 8  ;;  %2981 = vmatpush.bf16.xpose.msra.mxu1 %v2972_v25 }
 0xe30   :  { %v2888_v13 = vpop.xlane.xlu0 %2887 }
 0xe31   :  { %4426 = vrcp.f32 %v2888_v13 }
 0xe37   :  { %v4427_v35 = vpop.eup %4426 }
 0xe38   :  { %v2896_v14 = vmul.f32 %v4427_v35, %v4419_v0 }
 0xe3a   :  { %v2900_v38 = vpack.c.bf16 %v2896_v14, %v2896_v14 }
 0xe3c   :  { %v3056_v41 = vsel %vm572_vm1, %v2900_v38, 0 }
 0xe3d   :  { %3065 = vmatpush.bf16.xpose.msrb.mxu0 %v3056_v41 }
 0xe3e   :  { %v2885_v15 = vpop.xlane.xlu2 %2884 }
 0xe3f   :  { %4428 = vrcp.f32 %v2885_v15 }
 0xe45   :  { %v4429_v17 = vpop.eup %4428 }
 0xe46   :  { %v2882_v19 = vpop.xlane.xlu2 %2881  ;;  %v2895_v22 = vmul.f32 %v4429_v17, %v4421_v39 }
 0xe47   :  { %4430 = vrcp.f32 %v2882_v19 }
 0xe48   :  { %v2899_v40 = vpack.c.bf16 %v2895_v22, %v2895_v22 }
 0xe4a   :  { %v3028_v34 = vsel %vm572_vm1, %v2899_v40, 0 }
 0xe4b   :  { %3037 = vmatpush.bf16.xpose.msra.mxu3 %v3028_v34 }
 0xe4d   :  { %v4431_v18 = vpop.eup %4430 }
 0xe4e   :  { %v2894_v37 = vmul.f32 %v4431_v18, %v4423_v32 }
 0xe50   :  { %v2898_v29 = vpack.c.bf16 %v2894_v37, %v2894_v37 }
 0xe52   :  { %v3000_v44 = vsel %vm572_vm1, %v2898_v29, 0 }
 0xe53   :  { %3009 = vmatpush.bf16.xpose.msra.mxu2 %v3000_v44 }
 0xe7e   :  { %v4292_v45 = vpop.trf.xlu1 }
 0xe7f   :  { %3947 = vmatmul.msk.bf16.vlgmr.msra.gmra.mxu1 %vm572_vm1, %v4292_v45 }
 0xe86   :  { %v4293_v49 = vpop.trf.xlu1 }
 0xe87   :  { %3953 = vmatmul.msk.bf16.vlgmr.msrb.gmra.mxu0 %vm572_vm1, %v4293_v49 }
 0xe8e   :  { %v4294_v51 = vpop.trf.xlu1 }
 0xe8f   :  { %3948 = vmatmul.msk.bf16.gmra.mxu1 %vm572_vm1, %v4294_v51 }
 0xe96   :  { %v4295_v52 = vpop.trf.xlu1 }
 0xe97   :  { %3954 = vmatmul.msk.bf16.gmra.mxu0 %vm572_vm1, %v4295_v52 }
 0xe9d   :  { %v4287_v46 = vpop.trf.xlu2 }
 0xe9e   :  { %3951 = vmatmul.msk.bf16.vlgmr.msra.gmra.mxu3 %vm572_vm1, %v4287_v46 }
 0xea5   :  { %v4288_v54 = vpop.trf.xlu2 }
 0xea6   :  { %3949 = vmatmul.msk.bf16.vlgmr.msra.gmra.mxu2 %vm572_vm1, %v4288_v54 }
 0xead   :  { %v4289_v55 = vpop.trf.xlu2 }
 0xeae   :  { %3952 = vmatmul.msk.bf16.gmra.mxu3 %vm572_vm1, %v4289_v55 }
 0xeb5   :  { %v4290_v56 = vpop.trf.xlu2 }
 0xeb6   :  { %3950 = vmatmul.msk.bf16.gmra.mxu2 %vm572_vm1, %v4290_v56 }
 0xebd   :  { %v4304_v16 = vpop.trf.xlu2 }
 0xebe   :  { %v4308_v25 = vunpack.i.h.bf16 %v4304_v16 }
 0xefc   :  { %v2983_v36 = vpop.f32.mrf.mxu1 }
 0xf04   :  { %v3067_v57 = vpop.f32.mrf.mxu0  ;;  %v2985_v21 = vpop.f32.mrf.mxu1 }
 0xf05   :  { %v4309_v58 = vpack.i.bf16 %v3067_v57, %v2983_v36  ;;  %v4114_v57 = vld [vmem:[#allocation8 + $0x1f8] sm:$0xff] }
 0xf06   :  { %3380 = vmatpush.bf16.msrb.mxu1 %v4114_v57 }
 0xf07   :  { %4310 = vxpose.xlu1.b32.start [1/4] (short) (narrow) %v4309_v58, 8 }
 0xf0c   :  { %v3069_v43 = vpop.f32.mrf.mxu0  ;;  %v2988_v60 = vpop.f32.mrf.mxu1 }
 0xf0d   :  { %v4311_v48 = vpack.i.bf16 %v3069_v43, %v2985_v21 }
 0xf0f   :  { %4312 = vxpose.xlu1.b32.cont [2/4] (short) (narrow) %v4311_v48, 8 }
 0xf14   :  { %v3072_v62 = vpop.f32.mrf.mxu0  ;;  %v2990_v0 = vpop.f32.mrf.mxu1 }
 0xf15   :  { %v4313_v63 = vpack.i.bf16 %v3072_v62, %v2988_v60 }
 0xf17   :  { %4314 = vxpose.xlu1.b32.cont [3/4] (short) (narrow) %v4313_v63, 8  ;;  %v4113_v63 = vld [vmem:[#allocation8 + $0x1f0] sm:$0xff] }
 0xf18   :  { %3381 = vmatpush.bf16.msrb.mxu1 %v4113_v63 }
 0xf1c   :  { %v3074_v1 = vpop.f32.mrf.mxu0 }
 0xf1d   :  { %v4315_v59 = vpack.i.bf16 %v3074_v1, %v2990_v0 }
 0xf1f   :  { %4316 = vxpose.xlu1.b32.end [4/4] (short) (narrow) %v4315_v59, 8 }
 0xf21   :  { %v3039_v3 = vpop.f32.mrf.mxu3 }
 0xf22   :  { %v4322_v4 = vpack.i.bf16 %v3039_v3, %v5138_v23 }
 0xf24   :  { %4323 = vxpose.xlu0.b32.start [1/4] (short) (narrow) %v4322_v4, 8 }
 0xf29   :  { %v3011_v5 = vpop.f32.mrf.mxu2  ;;  %v3041_v39 = vpop.f32.mrf.mxu3 }
 0xf2a   :  { %v4335_v9 = vpack.i.bf16 %v3011_v5, %v5145_v30  ;;  %v4324_v6 = vpack.i.bf16 %v3041_v39, %v5147_v33 }
 0xf2c   :  { %4325 = vxpose.xlu0.b32.cont [2/4] (short) (narrow) %v4324_v6, 8  ;;  %4336 = vxpose.xlu2.b32.start [1/4] (short) (narrow) %v4335_v9, 8 }
 0xf31   :  { %v3013_v32 = vpop.f32.mrf.mxu2  ;;  %v3044_v61 = vpop.f32.mrf.mxu3 }
 0xf32   :  { %v4337_v8 = vpack.i.bf16 %v3013_v32, %v5149_v7  ;;  %v4326_v10 = vpack.i.bf16 %v3044_v61, %v5151_v42  ;;  %v4305_v7 = vunpack.i.l.bf16 %v4304_v16  ;;  %v2585_v42 = vrot.slane %v4308_v25, 4 }
 0xf34   :  { %4327 = vxpose.xlu0.b32.cont [3/4] (short) (narrow) %v4326_v10, 8  ;;  %4338 = vxpose.xlu2.b32.cont [2/4] (short) (narrow) %v4337_v8, 8  ;;  %v2575_v17 = vrot.slane %v4305_v7, 4 }
 0xf39   :  { %v3016_v11 = vpop.f32.mrf.mxu2  ;;  %v3046_v23 = vpop.f32.mrf.mxu3 }
 0xf3a   :  { %v4339_v2 = vpack.i.bf16 %v3016_v11, %v5154_v47  ;;  %v4328_v12 = vpack.i.bf16 %v3046_v23, %v5156_v24 }
 0xf3c   :  { %4329 = vxpose.xlu0.b32.end [4/4] (short) (narrow) %v4328_v12, 8  ;;  %4340 = vxpose.xlu2.b32.cont [3/4] (short) (narrow) %v4339_v2, 8  ;;  %v4112_v2 = vld [vmem:[#allocation8 + $0x1e8] sm:$0xff] }
 0xf3d   :  { %3382 = vmatpush.bf16.msrb.mxu1 %v4112_v2 }
 0xf41   :  { %v3018_v30 = vpop.f32.mrf.mxu2 }
 0xf42   :  { %v4341_v33 = vpack.i.bf16 %v3018_v30, %v5158_v50 }
 0xf44   :  { %4342 = vxpose.xlu2.b32.end [4/4] (short) (narrow) %v4341_v33, 8 }
 0xfab   :  { %v4317_v28 = vpop.trf.xlu1 }
 0xfac   :  { %v4321_v13 = vunpack.i.h.bf16 %v4317_v28  ;;  %v4318_v35 = vunpack.i.l.bf16 %v4317_v28 }
 0xfae   :  { %v3217_v14 = vrot.slane %v4321_v13, 4  ;;  %v3207_v47 = vrot.slane %v4318_v35, 4 }
 0xfc5   :  { %v4343_v38 = vpop.trf.xlu2 }
 0xfc6   :  { %v4347_v41 = vunpack.i.h.bf16 %v4343_v38  ;;  %v4344_v15 = vunpack.i.l.bf16 %v4343_v38 }
 0xfc8   :  { %v4330_v19 = vpop.trf.xlu0  ;;  %v3218_v24 = vsel %vm926_vm2, %v3217_v14, %v4347_v41  ;;  %v3219_v22 = vrot.slane %v4347_v41, 4  ;;  %v2586_v40 = vsel %vm926_vm2, %v2585_v42, %v4344_v15  ;;  %v2587_v50 = vrot.slane %v4344_v15, 4 }
 0xfc9   :  { %v4334_v34 = vunpack.i.h.bf16 %v4330_v19  ;;  %v4331_v18 = vunpack.i.l.bf16 %v4330_v19  ;;  %v3224_v29 = vperm.slane %v3218_v24, %v4915_v26  ;;  %v2592_v45 = vperm.slane %v2586_v40, %v4915_v26 }
 0xfca   :  { %v3220_v37 = vsel %vm926_vm2, %v4321_v13, %v3219_v22  ;;  %v2588_v44 = vsel %vm926_vm2, %v4308_v25, %v2587_v50 }
 0xfcb   :  { %v3205_v49 = vrot.slane %v4334_v34, 4  ;;  %v2573_v51 = vrot.slane %v4331_v18, 4  ;;  %v2576_v52 = vsel %vm926_vm2, %v4331_v18, %v2575_v17  ;;  %v3208_v46 = vsel %vm926_vm2, %v4334_v34, %v3207_v47 }
 0xfcc   :  { %v2584_v54 = vperm.slane %v2576_v52, %v4915_v26  ;;  %v3216_v55 = vperm.slane %v3208_v46, %v4915_v26  ;;  %v3228_v56 = vperm.slane %v3220_v37, %v4915_v26  ;;  %v3229_v36 = vrot.slane %v3224_v29, 4 }
 0xfcd   :  { %v2574_v58 = vsel %vm926_vm2, %v2573_v51, %v4305_v7  ;;  %v3206_v21 = vsel %vm926_vm2, %v3205_v49, %v4318_v35  ;;  %v2596_v43 = vperm.slane %v2588_v44, %v4915_v26  ;;  %v2597_v59 = vrot.slane %v2592_v45, 4 }
 0xfce   :  { %v2580_v48 = vperm.slane %v2574_v58, %v4915_v26  ;;  %v3212_v60 = vperm.slane %v3206_v21, %v4915_v26  ;;  %v3243_v62 = vrot.slane %v3216_v55, 4  ;;  %v2611_v0 = vrot.slane %v2584_v54, 4 }
 0xfcf   :  { %v3241_v1 = vrot.slane %v3228_v56, 4  ;;  %v2609_v3 = vrot.slane %v2596_v43, 4 }
 0xfd0   :  { %v2599_v4 = vrot.slane %v2580_v48, 4  ;;  %v3231_v16 = vrot.slane %v3212_v60, 4  ;;  %v3230_v5 = vsel %vm926_vm2, %v3229_v36, %v3212_v60  ;;  %v3244_v39 = vsel %vm926_vm2, %v3228_v56, %v3243_v62 }
 0xfd1   :  { %v3236_v9 = vperm.slane %v3230_v5, %v4925_v53  ;;  %v3242_v6 = vsel %vm926_vm2, %v3241_v1, %v3216_v55  ;;  %v3252_v32 = vperm.slane %v3244_v39, %v4925_v53  ;;  %v2598_v61 = vsel %vm926_vm2, %v2597_v59, %v2580_v48 }
 0xfd2   :  { %v3232_v8 = vsel %vm926_vm2, %v3224_v29, %v3231_v16  ;;  %v3248_v10 = vperm.slane %v3242_v6, %v4925_v53  ;;  %v2600_v11 = vsel %vm926_vm2, %v2592_v45, %v2599_v4  ;;  %v2604_v23 = vperm.slane %v2598_v61, %v4925_v53 }
 0xfd3   :  { %v3240_v12 = vperm.slane %v3232_v8, %v4925_v53  ;;  %v3253_v30 = vrot.slane %v3236_v9, 4  ;;  %v3259_v33 = vrot.slane %v3252_v32, 4  ;;  %v2608_v28 = vperm.slane %v2600_v11, %v4925_v53 }
 0xfd4   :  { %v3257_v25 = vrot.slane %v3248_v10, 4  ;;  %v2610_v13 = vsel %vm926_vm2, %v2609_v3, %v2584_v54  ;;  %v2612_v7 = vsel %vm926_vm2, %v2596_v43, %v2611_v0  ;;  %v2621_v35 = vrot.slane %v2604_v23, 4 }
 0xfd5   :  { %v3254_v42 = vsel %vm926_vm2, 0.0, %v3253_v30  ;;  %v3255_v14 = vrot.slane %v3240_v12, 4  ;;  %v3260_v38 = vsel %vm926_vm2, 0.0, %v3259_v33  ;;  %v2616_v41 = vperm.slane %v2610_v13, %v4925_v53 }
 0xfd6   :  { %v3277_v15 = vrot.slane %v3260_v38, 4  ;;  %v2620_v17 = vperm.slane %v2612_v7, %v4925_v53  ;;  %v2622_v47 = vsel %vm926_vm2, 0.0, %v2621_v35  ;;  %v2623_v19 = vrot.slane %v2608_v28, 4 }
 0xfd7   :  { %v3256_v24 = vsel %vm926_vm2, 0.0, %v3255_v14  ;;  %v2625_v22 = vrot.slane %v2616_v41, 4  ;;  %v3258_v40 = vsel %vm926_vm2, 0.0, %v3257_v25  ;;  %v3261_v50 = vsel %vm926_vm2, %v3255_v14, %v3236_v9 }
 0xfd8   :  { %v3266_v34 = vrot.slane %v3256_v24, 4  ;;  %v2624_v18 = vsel %vm926_vm2, 0.0, %v2623_v19  ;;  %v2627_v37 = vrot.slane %v2620_v17, 4  ;;  %v2629_v29 = vsel %vm926_vm2, %v2623_v19, %v2604_v23 }
 0xfd9   :  { %v2634_v44 = vrot.slane %v2624_v18, 4  ;;  %v2626_v45 = vsel %vm926_vm2, 0.0, %v2625_v22  ;;  %v2633_v49 = vperm.slane %v2629_v29, %v4915_v26  ;;  %v3265_v51 = vperm.slane %v3261_v50, %v4915_v26 }
 0xfda   :  { %v2628_v52 = vsel %vm926_vm2, 0.0, %v2627_v37  ;;  %v2640_v46 = vsel %vm926_vm2, %v2627_v37, %v2616_v41  ;;  %v3267_v54 = vsel %vm926_vm2, %v3266_v34, %v3254_v42  ;;  %v3272_v55 = vsel %vm926_vm2, %v3259_v33, %v3248_v10 }
 0xfdb   :  { %v2645_v56 = vrot.slane %v2628_v52, 4  ;;  %v2635_v36 = vsel %vm926_vm2, %v2634_v44, %v2622_v47  ;;  %v2644_v57 = vperm.slane %v2640_v46, %v4915_v26  ;;  %v3271_v58 = vperm.slane %v3267_v54, %v4915_v26  ;;  %v4111_v44 = vld [vmem:[#allocation8 + $0x1e0] sm:$0xff] }
 0xfdc   :  { %v2639_v21 = vperm.slane %v2635_v36, %v4915_v26  ;;  %v3276_v43 = vperm.slane %v3272_v55, %v4915_v26  ;;  %v3278_v48 = vsel %vm926_vm2, %v3277_v15, %v3258_v40  ;;  %v2653_v60 = vrot.slane %v2633_v49, 4  ;;  %3383 = vmatpush.bf16.msrb.mxu1 %v4111_v44  ;;  %v4107_v52 = vld [vmem:[#allocation8 + $0x1c0] sm:$0xff] }
 0xfdd   :  { %v2646_v62 = vsel %vm926_vm2, %v2645_v56, %v2626_v45  ;;  %v3282_v63 = vperm.slane %v3278_v48, %v4915_v26  ;;  %v3283_v0 = vrot.slane %v3271_v58, 4  ;;  %v2665_v1 = vrot.slane %v2644_v57, 4  ;;  %v4110_v45 = vld [vmem:[#allocation8 + $0x1d8] sm:$0xff] }
 0xfde   :  { %v2650_v59 = vperm.slane %v2646_v62, %v4915_v26  ;;  %v2651_v3 = vrot.slane %v2639_v21, 4  ;;  %v2654_v4 = vsel %vm926_vm2, %v2639_v21, %v2653_v60  ;;  %v3285_v16 = vrot.slane %v3265_v51, 4 }
 0xfdf   :  { %v3284_v5 = vsel %vm926_vm2, %v3283_v0, %v3265_v51  ;;  %v3295_v39 = vrot.slane %v3282_v63, 4  ;;  %v2662_v9 = vperm.slane %v2654_v4, %v4925_v53  ;;  %v3297_v6 = vrot.slane %v3276_v43, 4  ;;  %v4108_v51 = vld [vmem:[#allocation8 + $0x1c8] sm:$0xff] }
 0xfe0   :  { %v2652_v32 = vsel %vm926_vm2, %v2651_v3, %v2633_v49  ;;  %v2663_v61 = vrot.slane %v2650_v59, 4  ;;  %v3290_v8 = vperm.slane %v3284_v5, %v4925_v53  ;;  %v2666_v10 = vsel %vm926_vm2, %v2650_v59, %v2665_v1  ;;  %3384 = vmatpush.bf16.msrb.mxu1 %v4110_v45  ;;  %v4109_v49 = vld [vmem:[#allocation8 + $0x1d0] sm:$0xff]  ;;  %v4443_v3 = vld [vmem:[#allocation10] sm:$0xff] }
 0xfe1   :  { %v2658_v11 = vperm.slane %v2652_v32, %v4925_v53  ;;  %v3296_v26 = vsel %vm926_vm2, %v3295_v39, %v3276_v43  ;;  %v2674_v23 = vperm.slane %v2666_v10, %v4925_v53  ;;  %v2681_v2 = vrot.slane %v2662_v9, 4 }
 0xfe2   :  { %v2664_v12 = vsel %vm926_vm2, %v2663_v61, %v2644_v57  ;;  %v3302_v30 = vperm.slane %v3296_v26, %v4925_v53  ;;  %v3309_v33 = vrot.slane %v3290_v8, 4  ;;  %v3286_v28 = vsel %vm926_vm2, %v3271_v58, %v3285_v16 }
 0xfe3   :  { %v2670_v25 = vperm.slane %v2664_v12, %v4925_v53  ;;  %v2677_v13 = vrot.slane %v2658_v11, 4  ;;  %v2679_v7 = vrot.slane %v2674_v23, 4  ;;  %v3294_v35 = vperm.slane %v3286_v28, %v4925_v53  ;;  %v4121_v28 = vld [vmem:[#allocation11 + $0x30] sm:$0xff] }
 0xfe4   :  { %v3310_v42 = vsel %vm926_vm2, %v3302_v30, %v3309_v33  ;;  %v3298_v14 = vsel %vm926_vm2, %v3282_v63, %v3297_v6  ;;  %v3307_v38 = vrot.slane %v3302_v30, 4  ;;  %v2682_v47 = vsel %vm926_vm2, %v2674_v23, %v2681_v2  ;;  %3385 = vmatpush.bf16.msrb.mxu1 %v4109_v49 }
 0xfe5   :  { %v2678_v41 = vsel %vm926_vm2, %v2670_v25, %v2677_v13  ;;  %v3306_v15 = vperm.slane %v3298_v14, %v4925_v53  ;;  %v3313_v17 = vrot.slane %v3294_v35, 4  ;;  %v2675_v24 = vrot.slane %v2670_v25, 4  ;;  %v4119_v25 = vld [vmem:[#allocation11 + $0x20] sm:$0xff]  ;;  %v4118_v13 = vld [vmem:[#allocation11 + $0x18] sm:$0xff] }
 0xfe6   :  { %v4348_v19 = vpack.i.bf16 %v3310_v42, %v2678_v41  ;;  %v3308_v22 = vsel %vm926_vm2, %v3307_v38, %v3290_v8  ;;  %v2680_v40 = vsel %vm926_vm2, %v2679_v7, %v2662_v9  ;;  %v3331_v4 = vperm.slane %v4443_v3, 7  ;;  %v4117_v7 = vld [vmem:[#allocation11 + $0x10] sm:$0xff]  ;;  %v4116_v38 = vld [vmem:[#allocation11 + $0x8] sm:$0xff]  ;;  %v4115_v41 = vld [vmem:[#allocation11] sm:$0xff] }
 0xfe7   :  { %v3311_v50 = vrot.slane %v3306_v15, 4  ;;  %v3314_v34 = vsel %vm926_vm2, %v3306_v15, %v3313_v17  ;;  %v2676_v37 = vsel %vm926_vm2, %v2675_v24, %v2658_v11  ;;  %v4130_v15 = vld [vmem:[#allocation13 + $0x38] sm:$0xff]  ;;  %v4123_v3 = vld [vmem:[#allocation13] sm:$0xff] }
 0xfe8   :  { %4349 = vrot.lane.b32.xlu1 %v4348_v19, %s4658_s4  ;;  %v4358_v18 = vpack.i.bf16 %v3314_v34, %v2682_v47  ;;  %3386 = vmatpush.bf16.msrb.mxu1 %v4108_v51  ;;  %v4129_v19 = vld [vmem:[#allocation13 + $0x30] sm:$0xff] }
 0xfe9   :  { %v3312_v29 = vsel %vm926_vm2, %v3311_v50, %v3294_v35  ;;  %3594 = vmatpush.bf16.msrb.mxu3 %v4130_v15  ;;  %v4128_v50 = vld [vmem:[#allocation13 + $0x28] sm:$0xff] }
 0xfea   :  { %v4353_v53 = vpack.i.bf16 %v3312_v29, %v2680_v40  ;;  %4359 = vrot.lane.b32.xlu2 %v4358_v18, %s4659_s7 }
 0xfec   :  { %4354 = vrot.lane.b32.xlu0 %v4353_v53, %s4651_s17  ;;  %3387 = vmatpush.bf16.msrb.mxu1 %v4107_v52 }
 0xfed   :  { %3595 = vmatpush.bf16.msrb.mxu3 %v4129_v19 }
 0xff1   :  { %3596 = vmatpush.bf16.msrb.mxu3 %v4128_v50 }
0x1044   :  { %v4360_v56 = vpop.permute.xlu2 %4359 }
0x1045   :  { %v4362_v48 = vunpack.i.h.bf16 %v4360_v56  ;;  %v4361_v60 = vunpack.i.l.bf16 %v4360_v56 }
0x105a   :  { %v4350_v46 = vpop.permute.xlu1 %4349 }
0x105b   :  { %v4352_v54 = vunpack.i.h.bf16 %v4350_v46  ;;  %v4351_v55 = vunpack.i.l.bf16 %v4350_v46 }
0x105d   :  { %v3327_v36 = vsel %vm507_vm0, %v3308_v22, %v4352_v54  ;;  %v2695_v57 = vsel %vm507_vm0, %v2676_v37, %v4351_v55  ;;  %v4127_v37 = vld [vmem:[#allocation13 + $0x20] sm:$0xff]  ;;  %v5296_v54 = vld [vmem:[#allocation10 + $0x8] sm:$0x7f] }
0x105e   :  { %v4355_v58 = vpop.permute.xlu0 %4354  ;;  %3597 = vmatpush.bf16.msrb.mxu3 %v4127_v37  ;;  %v3438_v55 = vperm.slane %v5296_v54, 2  ;;  %v3652_v37 = vperm.slane %v5296_v54, 4 }
0x105f   :  { %v4357_v21 = vunpack.i.h.bf16 %v4355_v58  ;;  %v4356_v43 = vunpack.i.l.bf16 %v4355_v58  ;;  %v3441_v58 = vperm.slane %v5296_v54, 3 }
0x1061   :  { %v2696_v62 = vsel %vm1049_vm3, %v2695_v57, %v4356_v43  ;;  %v3328_v63 = vsel %vm1049_vm3, %v3327_v36, %v4357_v21 }
0x1062   :  { %v2697_v0 = vsel %vm1051_vm4, %v2696_v62, %v4361_v60  ;;  %v3329_v1 = vsel %vm1051_vm4, %v3328_v63, %v4362_v48 }
0x1063   :  { %v3330_v59 = vpack.c.bf16 %v3329_v1, %v2697_v0  ;;  %v4126_v0 = vld [vmem:[#allocation13 + $0x18] sm:$0xff]  ;;  %v4125_v1 = vld [vmem:[#allocation13 + $0x10] sm:$0xff] }
0x1064   :  { %3598 = vmatpush.bf16.msrb.mxu3 %v4126_v0 }
0x1065   :  { %3388 = vmatmul.bf16.vlgmr.msrb.gmra.mxu1 %v3330_v59  ;;  %v4124_v59 = vld [vmem:[#allocation13 + $0x8] sm:$0xff] }
0x1068   :  { %3599 = vmatpush.bf16.msrb.mxu3 %v4125_v1 }
0x106c   :  { %3600 = vmatpush.bf16.msrb.mxu3 %v4124_v59 }
0x1070   :  { %3601 = vmatpush.bf16.msrb.mxu3 %v4123_v3 }
0x10e2   :  { %v3389_v16 = vpop.f32.mrf.mxu1 }
0x10e3   :  { %v3390_v5 = vadd.f32 %v3389_v16, %v3331_v4  ;;  %v4363_v16 = vld [vmem:[%s5320_s6] ss:$0 sm:$0xff]  ;;  %s4663_s6 = smov [#allocation14]  }
0x10e4   :  { %s3664_s3 = sshll.u32 %s4663_s6, 4  ;;  %s3665_s3 = int_to_ptr.vmem [resolvable:$true] %s3664_s3 }
0x10e5   :  { %v3394_v39 = vadd.f32 %v3390_v5, %v5037_v27  ;;  %v4122_v27 = vld [vmem:[#allocation11 + $0x38] sm:$0xff] }
0x10e6   :  { %3512 = vmatpush.bf16.msrb.mxu2 %v4122_v27 }
0x10e7   :  { %3396 = vadd.xlane.f32.xlu1 %v3394_v39 }
0x10ea   :  { %v3391_v9 = vpop.f32.mrf.mxu1  ;;  %3513 = vmatpush.bf16.msrb.mxu2 %v4121_v28 }
0x10eb   :  { %v3392_v6 = vadd.f32 %v3391_v9, %v3331_v4 }
0x10ed   :  { %v3395_v32 = vadd.f32 %v3392_v6, %v5039_v20  ;;  %v4120_v20 = vld [vmem:[#allocation11 + $0x28] sm:$0xff] }
0x10ee   :  { %3514 = vmatpush.bf16.msrb.mxu2 %v4120_v20 }
0x10ef   :  { %3398 = vadd.xlane.f32.xlu0 %v3395_v32 }
0x10f2   :  { %3515 = vmatpush.bf16.msrb.mxu2 %v4119_v25 }
0x10f6   :  { %3516 = vmatpush.bf16.msrb.mxu2 %v4118_v13 }
0x10fa   :  { %3517 = vmatpush.bf16.msrb.mxu2 %v4117_v7 }
0x10fe   :  { %3518 = vmatpush.bf16.msrb.mxu2 %v4116_v38 }
0x1102   :  { %3519 = vmatpush.bf16.msrb.mxu2 %v4115_v41 }
0x115a   :  { %v3397_v61 = vpop.xlane.xlu1 %3396 }
0x115b   :  { %v3400_v8 = vmul.f32 0.03125, %v3397_v61 }
0x115d   :  { %v3402_v10 = vsub.f32 %v3394_v39, %v3400_v8  ;;  %v3545_v8 = vperm.slane %v5296_v54, 6 }
0x115f   :  { %v3404_v11 = vmul.f32 %v5019_v31, %v3402_v10 }
0x1161   :  { %v3406_v26 = vmul.f32 %v3404_v11, %v3404_v11 }
0x1162   :  { %v3399_v23 = vpop.xlane.xlu0 %3398 }
0x1163   :  { %v3401_v2 = vmul.f32 0.03125, %v3399_v23  ;;  %3408 = vadd.xlane.f32.xlu2 %v3406_v26 }
0x1165   :  { %v3403_v12 = vsub.f32 %v3395_v32, %v3401_v2 }
0x1167   :  { %v3405_v30 = vmul.f32 %v5019_v31, %v3403_v12 }
0x1169   :  { %v3407_v33 = vmul.f32 %v3405_v30, %v3405_v30 }
0x116b   :  { %3410 = vadd.xlane.f32.xlu1 %v3407_v33 }
0x11d6   :  { %v3409_v35 = vpop.xlane.xlu2 %3408 }
0x11d7   :  { %v3412_v42 = vmul.f32 0.03125, %v3409_v35 }
0x11d9   :  { %v3414_v14 = vadd.f32 1e-05, %v3412_v42 }
0x11db   :  { %4432 = vrsqrt.f32 %v3414_v14  ;;  %vm3422_vm13 = vweird.f32 %v3414_v14 }
0x11de   :  { %v3411_v17 = vpop.xlane.xlu1 %3410 }
0x11df   :  { %v3413_v47 = vmul.f32 0.03125, %v3411_v17 }
0x11e1   :  { %v4433_v24 = vpop.eup %4432  ;;  %v3415_v22 = vadd.f32 1e-05, %v3413_v47 }
0x11e2   :  { %v3417_v40 = vmul.f32 %v4433_v24, %v3414_v14  ;;  %vm3423_vm12 = vweird.f32 %v4433_v24 }
0x11e3   :  { %4434 = vrsqrt.f32 %v3415_v22  ;;  %vm3424_vm14 = vmor %vm3422_vm13, %vm3423_vm12  ;;  %vm3432_vm0 = vweird.f32 %v3415_v22 }
0x11e4   :  { %v3418_v34 = vmul.f32 %v4433_v24, %v3417_v40 }
0x11e6   :  { %v3419_v18 = vmul.f32 0.5, %v3418_v34 }
0x11e8   :  { %v3420_v29 = vsub.f32 1.5, %v3419_v18 }
0x11e9   :  { %v4435_v53 = vpop.eup %4434 }
0x11ea   :  { %v3421_v44 = vmul.f32 %v4433_v24, %v3420_v29  ;;  %v3427_v45 = vmul.f32 %v4435_v53, %v3415_v22  ;;  %vm3433_vm15 = vweird.f32 %v4435_v53 }
0x11eb   :  { %vm3434_vm1 = vmor %vm3432_vm0, %vm3433_vm15 }
0x11ec   :  { %v3428_v49 = vmul.f32 %v4435_v53, %v3427_v45  ;;  %v3425_v51 = vsel %vm3424_vm14, %v4433_v24, %v3421_v44  ;;  %v3655_v45 = vperm.slane %v5296_v54, 5 }
0x11ed   :  { %v3436_v56 = vmul.f32 %v3425_v51, %v3404_v11 }
0x11ee   :  { %v3429_v52 = vmul.f32 0.5, %v3428_v49 }
0x11ef   :  { %v3439_v21 = vmul.f32 %v3438_v55, %v3436_v56 }
0x11f0   :  { %v3430_v46 = vsub.f32 1.5, %v3429_v52 }
0x11f1   :  { %v3442_v60 = vadd.f32 %v3441_v58, %v3439_v21 }
0x11f2   :  { %v3431_v36 = vmul.f32 %v4435_v53, %v3430_v46 }
0x11f4   :  { %v3435_v57 = vsel %vm3434_vm1, %v4435_v53, %v3431_v36 }
0x11f5   :  { %v3437_v43 = vmul.f32 %v3435_v57, %v3405_v30 }
0x11f7   :  { %v3440_v48 = vmul.f32 %v3438_v55, %v3437_v43 }
0x11f9   :  { %v3443_v62 = vadd.f32 %v3441_v58, %v3440_v48 }
0x11fb   :  { %v3444_v63 = vpack.c.bf16 %v3443_v62, %v3442_v60 }
0x11fd   :  { %3520 = vmatmul.bf16.vlgmr.msrb.gmra.mxu2 %v3444_v63 }
0x1280   :  { %v3521_v4 = vpop.f32.mrf.mxu2 }
0x1281   :  { %v3522_v5 = vadd.f32 %v4363_v16, %v3521_v4 }
0x1283   :  { %v3526_v6 = vmax.f32 %v3522_v5, 0.0 }
0x1288   :  { %v3523_v39 = vpop.f32.mrf.mxu2 }
0x1289   :  { %v3524_v9 = vadd.f32 %v4363_v16, %v3523_v39 }
0x128b   :  { %v3527_v32 = vmax.f32 %v3524_v9, 0.0 }
0x128d   :  { %v3528_v61 = vpack.c.bf16 %v3527_v32, %v3526_v6 }
0x128f   :  { %3602 = vmatmul.bf16.vlgmr.msrb.gmra.mxu3 %v3528_v61 }
0x1312   :  { %v3603_v10 = vpop.f32.mrf.mxu3 }
0x1313   :  { %v3604_v11 = vadd.f32 %v3603_v10, %v3545_v8 }
0x1315   :  { %v3608_v26 = vadd.f32 %v3604_v11, %v3442_v60 }
0x1317   :  { %3610 = vadd.xlane.f32.xlu1 %v3608_v26 }
0x131a   :  { %v3605_v23 = vpop.f32.mrf.mxu3 }
0x131b   :  { %v3606_v2 = vadd.f32 %v3605_v23, %v3545_v8 }
0x131d   :  { %v3609_v12 = vadd.f32 %v3606_v2, %v3443_v62 }
0x131f   :  { %3612 = vadd.xlane.f32.xlu1 %v3609_v12 }
0x138a   :  { %v3611_v30 = vpop.xlane.xlu1 %3610 }
0x138b   :  { %v3614_v33 = vmul.f32 0.03125, %v3611_v30 }
0x138d   :  { %v3616_v27 = vsub.f32 %v3608_v26, %v3614_v33 }
0x138f   :  { %v3618_v28 = vmul.f32 %v5019_v31, %v3616_v27 }
0x1391   :  { %v3620_v20 = vmul.f32 %v3618_v28, %v3618_v28 }
0x1392   :  { %v3613_v25 = vpop.xlane.xlu1 %3612 }
0x1393   :  { %v3615_v13 = vmul.f32 0.03125, %v3613_v25  ;;  %3622 = vadd.xlane.f32.xlu0 %v3620_v20 }
0x1395   :  { %v3617_v7 = vsub.f32 %v3609_v12, %v3615_v13 }
0x1397   :  { %v3619_v35 = vmul.f32 %v5019_v31, %v3617_v7 }
0x1399   :  { %v3621_v42 = vmul.f32 %v3619_v35, %v3619_v35 }
0x139b   :  { %3624 = vadd.xlane.f32.xlu1 %v3621_v42 }
0x1406   :  { %v3623_v14 = vpop.xlane.xlu0 %3622 }
0x1407   :  { %v3626_v38 = vmul.f32 0.03125, %v3623_v14 }
0x1409   :  { %v3628_v41 = vadd.f32 1e-05, %v3626_v38 }
0x140b   :  { %4436 = vrsqrt.f32 %v3628_v41  ;;  %vm3636_vm3 = vweird.f32 %v3628_v41 }
0x140e   :  { %v3625_v15 = vpop.xlane.xlu1 %3624 }
0x140f   :  { %v3627_v17 = vmul.f32 0.03125, %v3625_v15 }
0x1411   :  { %v4437_v47 = vpop.eup %4436  ;;  %v3629_v19 = vadd.f32 1e-05, %v3627_v17 }
0x1412   :  { %v3631_v24 = vmul.f32 %v4437_v47, %v3628_v41  ;;  %vm3637_vm2 = vweird.f32 %v4437_v47 }
0x1413   :  { %4438 = vrsqrt.f32 %v3629_v19  ;;  %vm3638_vm4 = vmor %vm3636_vm3, %vm3637_vm2  ;;  %vm3646_vm6 = vweird.f32 %v3629_v19 }
0x1414   :  { %v3632_v22 = vmul.f32 %v4437_v47, %v3631_v24 }
0x1416   :  { %v3633_v40 = vmul.f32 0.5, %v3632_v22 }
0x1418   :  { %v3634_v50 = vsub.f32 1.5, %v3633_v40 }
0x1419   :  { %v4439_v34 = vpop.eup %4438 }
0x141a   :  { %v3635_v18 = vmul.f32 %v4437_v47, %v3634_v50  ;;  %v3641_v31 = vmul.f32 %v4439_v34, %v3629_v19  ;;  %vm3647_vm5 = vweird.f32 %v4439_v34 }
0x141b   :  { %vm3648_vm7 = vmor %vm3646_vm6, %vm3647_vm5 }
0x141c   :  { %v3639_v29 = vsel %vm3638_vm4, %v4437_v47, %v3635_v18  ;;  %v3642_v53 = vmul.f32 %v4439_v34, %v3641_v31 }
0x141d   :  { %v3650_v44 = vmul.f32 %v3639_v29, %v3618_v28 }
0x141e   :  { %v3643_v49 = vmul.f32 0.5, %v3642_v53 }
0x141f   :  { %v3653_v51 = vmul.f32 %v3652_v37, %v3650_v44 }
0x1420   :  { %v3644_v52 = vsub.f32 1.5, %v3643_v49 }
0x1421   :  { %v3656_v46 = vadd.f32 %v3655_v45, %v3653_v51 }
0x1422   :  { %v3645_v55 = vmul.f32 %v4439_v34, %v3644_v52 }
0x1423   :  { %3658 = vst [vmem:[#allocation14] sm:$0xff] %v3656_v46 }
0x1424   :  { %v3649_v56 = vsel %vm3648_vm7, %v4439_v34, %v3645_v55 }
0x1425   :  { %v3651_v36 = vmul.f32 %v3649_v56, %v3619_v35 }
0x1427   :  { %v3654_v57 = vmul.f32 %v3652_v37, %v3651_v36 }
0x1429   :  { %v3657_v58 = vadd.f32 %v3655_v45, %v3654_v57 }
0x142b   :  { %3659 = vst [vmem:[#allocation14 + $0x8] sm:$0xff] %v3657_v58 }
0x142c   :  { %3672 = dma.vmem_to_hbm [thread:$0]  %s3665_s3, 256, %s3667_s22, [#allocation4], %s4648_s13, %s4648_s13, %s4649_s14  }
0x142d   :  { %4645 = dma.done.wait [#allocation4], 256  }
0x142e   :  { %4646 = vsyncadd [#allocation4], 4294967040 }
0x142f   :  { %3677 = vsyncpa [#allocation3], 1 }
0x1430   :  { %3678 = vsyncpa [#allocation6], 1 }
0x1431   :  { %3679 = vsyncpa [#allocation9], 1 }
0x1432   :  { %3680 = vsyncpa [#allocation12], 1 }
0x1433   :  { %3681 = vsyncpa [#allocation4], 1 }

</bundles_post_ra>
